<compile_context>
chip_gen: v6e
topology: v6e:2x2x1
jax: 0.10.0
libtpu: 0.0.40
codegen_flags: <defaults>
</compile_context>

<pallas_src>
from functools import partial

import jax
import jax.numpy as jnp
from jax import lax
from jax.experimental import pallas as pl
from jax.experimental.pallas import tpu as pltpu


def _attention_kernel(x_ref, wqkv_ref, wproj_ref, bproj_ref, o_ref,
                      q_scr, kT_scr, v_scr, ctx_scr, *, num_heads, n_valid):
    # x_ref:     (N, C)    full (padded) token sequence for one batch element
    # wqkv_ref:  (C, 3C)   softmax scale already folded into the first C columns
    # wproj_ref: (C, C)
    # bproj_ref: (1, C)
    # o_ref:     (tq, C)   one query tile of the output
    # q_scr:     (N, C)    pre-scaled Q           (compute dtype, persists across qi)
    # kT_scr:    (C, N)    K^T                    (compute dtype, persists across qi)
    # v_scr:     (N, C)    V                      (compute dtype, persists across qi)
    # ctx_scr:   (tq, C)   merged-head context    (lane-dense)
    qi = pl.program_id(1)
    N, C = x_ref.shape          # N is the padded token count
    tq = o_ref.shape[0]
    H = num_heads
    hd = C // H
    cdt = q_scr.dtype           # compute (MXU-operand) dtype

    # ---- Once per batch element: QKV projection + K transpose (amortized over
    # the nq query tiles; native-dtype operands, f32 MXU accumulation). --------
    @pl.when(qi == 0)
    def _():
        qkv = jnp.dot(x_ref[...], wqkv_ref[...],
                      preferred_element_type=jnp.float32)         # (N, 3C) f32
        q_scr[...] = qkv[:, :C].astype(cdt)                       # pre-scaled Q
        v_scr[...] = qkv[:, 2 * C:].astype(cdt)                   # V
        # Hoisted K transpose: one f32 XLU transpose per batch element.
        kT_scr[...] = jnp.transpose(qkv[:, C:2 * C]).astype(cdt)  # (C, N)

    row0 = pl.multiple_of(qi * tq, tq)

    # Key-validity mask for padded token columns (static: elided when no padding).
    if n_valid < N:
        key_valid = lax.broadcasted_iota(jnp.int32, (tq, N), 1) < n_valid

    # ---- Per-head attention for this query tile. Static Python unroll over H
    # (audit for vreg spills at large H; switch to lax.fori_loop(unroll=2) if so).
    # Head slabs start at lane offset h*hd; pairing heads into (tq,128) slabs
    # would halve misaligned loads/stores when hd == 64 (left as a follow-on).
    for h in range(H):
        c0 = h * hd
        q = q_scr[pl.ds(row0, tq), pl.ds(c0, hd)]                 # (tq, hd), pre-scaled
        kT = kT_scr[pl.ds(c0, hd), :]                             # (hd, N)
        v = v_scr[:, pl.ds(c0, hd)]                               # (N, hd)

        s = jnp.dot(q, kT, preferred_element_type=jnp.float32)    # (tq, N) "NN" matmul
        if n_valid < N:
            s = jnp.where(key_valid, s, jnp.float32(-1e30))       # mask padded keys
        m = jnp.max(s, axis=-1, keepdims=True)                    # f32 row max
        p = jnp.exp((s - m).astype(cdt))                          # EUP exp in compute dtype
        l = jnp.sum(p, axis=-1, keepdims=True, dtype=jnp.float32) # f32 row sum
        ctx = jnp.dot(p, v, preferred_element_type=jnp.float32)   # (tq, hd), un-normalized
        ctx = ctx * pl.reciprocal(l, approx=True)                 # deferred normalization
        ctx_scr[:, pl.ds(c0, hd)] = ctx.astype(cdt)

    # ---- Output projection (+ bias): one monolithic K=C matmul and a single
    # lane-dense (tq, C) store. -------------------------------------------------
    out = jnp.dot(ctx_scr[...], wproj_ref[...], preferred_element_type=jnp.float32)
    out = out + bproj_ref[...].astype(jnp.float32)                # (1, C) broadcasts
    o_ref[...] = out.astype(o_ref.dtype)


def _round_up(n, m):
    return ((n + m - 1) // m) * m


def _preferred_q_tile():
    # v6e / v7x have a 256-wide MXU; v5e (and older) are 128-wide.
    try:
        kind = jax.devices()[0].device_kind.lower()
    except Exception:
        kind = ""
    return 256 if ("v6" in kind or "v7" in kind) else 128


def _pick_query_tile(n_pad, preferred):
    for t in dict.fromkeys((preferred, 256, 128, 64, 32, 16, 8)):
        if t <= n_pad and n_pad % t == 0:
            return t
    return n_pad


def _vmem_capacity_bytes():
    try:
        info = pltpu.get_tpu_info()
        for name in ("vmem_capacity_bytes", "vmem_size_bytes", "vmem_bytes"):
            v = getattr(info, name, None)
            if v:
                return int(v)
    except Exception:
        pass
    return 64 << 20  # v7x physical VMEM (smallest of the targeted generations)


def attention_pallas(x, w_qkv, w_proj, b_proj, *, num_heads,
                     q_tile=None, compute_dtype=jnp.bfloat16):
    B, N, C = x.shape
    assert C % num_heads == 0
    head_dim = C // num_heads
    scale = head_dim ** (-0.5)
    out_dtype = x.dtype
    cdt = jnp.dtype(compute_dtype)

    # Fold the softmax scale into the Q columns of w_qkv (exact: (x@Wq)*s == x@(Wq*s));
    # fold in the weights' original precision, then cast once to the compute dtype.
    w_qkv_scaled = w_qkv.at[:, :C].multiply(scale).astype(cdt)
    w_proj_c = w_proj.astype(cdt)
    b_proj2d = b_proj.reshape(1, C)            # added in f32 inside the kernel

    # Pad the token axis: multiple of 128 at ViT scale (lane-dense (tq, N) scores),
    # multiple of 8 (sublane) otherwise. Padded key columns are masked in-kernel.
    pad_to = 128 if N >= 128 else 8
    N_pad = _round_up(N, pad_to)
    x_c = x.astype(cdt)
    if N_pad != N:
        x_c = jnp.pad(x_c, ((0, 0), (0, N_pad - N), (0, 0)))

    tq = q_tile if q_tile is not None else _pick_query_tile(N_pad, _preferred_q_tile())
    assert N_pad % tq == 0, "query tile must divide the (padded) token count"
    assert tq == N_pad or tq % 8 == 0, "query tile must be a multiple of 8 (sublane)"
    nq = N_pad // tq

    kernel = partial(_attention_kernel, num_heads=num_heads, n_valid=N)

    def build(single_buffer_weights):
        w_kw = {"pipeline_mode": pl.Buffered(1)} if single_buffer_weights else {}
        w_copies = 1 if single_buffer_weights else 2

        # Explicit VMEM budget: buffers + scratches + headroom for f32 (tq, N) temps,
        # capped at 90% of this generation's physical VMEM.
        needed = (
            2 * N_pad * C * cdt.itemsize                                    # x (double-buffered)
            + w_copies * ((C * 3 * C + C * C) * cdt.itemsize
                          + C * jnp.dtype(b_proj.dtype).itemsize)           # weights + bias
            + 2 * tq * C * jnp.dtype(out_dtype).itemsize                    # out tile (double-buffered)
            + (3 * N_pad * C + tq * C) * cdt.itemsize                       # Q, K^T, V, ctx scratches
        )
        vmem_limit = max(needed + (8 << 20), 32 << 20)
        vmem_limit = int(min(vmem_limit, int(0.9 * _vmem_capacity_bytes())))

        return pl.pallas_call(
            kernel,
            out_shape=jax.ShapeDtypeStruct((B, N_pad, C), out_dtype),
            grid_spec=pltpu.PrefetchScalarGridSpec(
                num_scalar_prefetch=0,
                grid=(B, nq),
                in_specs=[
                    # x: constant over the qi axis -> DMA'd once per batch element.
                    pl.BlockSpec((None, N_pad, C), lambda b, qi: (b, 0, 0)),
                    # Weights / bias: constant index_map -> DMA'd once; single-buffered
                    # when supported (their index_maps never change).
                    pl.BlockSpec((C, 3 * C), lambda b, qi: (0, 0), **w_kw),
                    pl.BlockSpec((C, C), lambda b, qi: (0, 0), **w_kw),
                    pl.BlockSpec((1, C), lambda b, qi: (0, 0), **w_kw),
                ],
                out_specs=pl.BlockSpec((None, tq, C), lambda b, qi: (b, qi, 0)),
                scratch_shapes=[
                    pltpu.VMEM((N_pad, C), cdt),     # pre-scaled Q  (per batch element)
                    pltpu.VMEM((C, N_pad), cdt),     # K^T           (per batch element)
                    pltpu.VMEM((N_pad, C), cdt),     # V             (per batch element)
                    pltpu.VMEM((tq, C), cdt),        # merged-head context (per tile)
                ],
            ),
            compiler_params=pltpu.CompilerParams(
                # qi must stay "arbitrary": the Q/K^T/V scratches written at qi==0 are
                # reused by later query tiles of the same batch element.
                dimension_semantics=("parallel", "arbitrary"),
                vmem_limit_bytes=vmem_limit,
            ),
        )

    try:
        out = build(True)(x_c, w_qkv_scaled, w_proj_c, b_proj2d)
    except Exception:
        # Fallback if single-buffered (Buffered(1)) pipelining is unsupported here.
        out = build(False)(x_c, w_qkv_scaled, w_proj_c, b_proj2d)

    if N_pad != N:
        out = out[:, :N, :]
    return out


def attention_reference(x, w_qkv, w_proj, b_proj, *, num_heads):
    """Plain-JAX reference mirroring the PyTorch forward exactly (f32)."""
    B, N, C = x.shape
    hd = C // num_heads
    scale = hd ** (-0.5)
    qkv = x @ w_qkv                                            # (B, N, 3C)
    qkv = qkv.reshape(B, N, 3, num_heads, hd).transpose(2, 0, 3, 1, 4)
    q, k, v = qkv[0], qkv[1], qkv[2]                           # (B, H, N, hd)
    attn = (q @ k.transpose(0, 1, 3, 2)) * scale
    attn = jax.nn.softmax(attn, axis=-1)
    out = (attn @ v).transpose(0, 2, 1, 3).reshape(B, N, C)
    return out @ w_proj + b_proj


if __name__ == "__main__":
    # Small shapes consistent with the module: dim=32, num_heads=8 (head_dim=4).
    # Real perf validation should use ViT-scale shapes (N=197..577, C=768..1024).
    B, N, C = 2, 16, 32
    num_heads = 8

    key = jax.random.PRNGKey(0)
    k_x, k_qkv, k_proj, k_bias = jax.random.split(key, 4)
    x = jax.random.normal(k_x, (B, N, C), dtype=jnp.float32)
    w_qkv = jax.random.normal(k_qkv, (C, 3 * C), dtype=jnp.float32) * 0.05
    w_proj = jax.random.normal(k_proj, (C, C), dtype=jnp.float32) * 0.05
    b_proj = jax.random.normal(k_bias, (C,), dtype=jnp.float32) * 0.05

    # 1) f32-compute path with explicit query tiling (2 tiles per batch element):
    #    only the approximate softmax reciprocal separates it from the reference.
    out32 = attention_pallas(x, w_qkv, w_proj, b_proj, num_heads=num_heads,
                             q_tile=8, compute_dtype=jnp.float32)
    out32 = jax.block_until_ready(out32)
    ref = attention_reference(x, w_qkv, w_proj, b_proj, num_heads=num_heads)
    assert out32.shape == (B, N, C)
    err32 = float(jnp.max(jnp.abs(out32 - ref)))
    assert jnp.allclose(out32, ref, atol=1e-2, rtol=1e-2), \
        f"f32 path mismatch vs reference (max abs err {err32})"

    # 2) Default bf16-compute path with a non-8-aligned token count (N=12 pads to
    #    16 and exercises the padded-key masking). Tolerance covers bf16 operands.
    x2 = x[:, :12, :]
    outbf = attention_pallas(x2, w_qkv, w_proj, b_proj, num_heads=num_heads)
    outbf = jax.block_until_ready(outbf)
    ref2 = attention_reference(x2, w_qkv, w_proj, b_proj, num_heads=num_heads)
    assert outbf.shape == (B, 12, C)
    errbf = float(jnp.max(jnp.abs(outbf.astype(jnp.float32) - ref2)))
    assert jnp.allclose(outbf.astype(jnp.float32), ref2, atol=3e-2, rtol=3e-2), \
        f"bf16 path mismatch vs reference (max abs err {errbf})"

    print("KERNEL_OK")
</pallas_src>

<mosaic_0001>
module attributes {stable_mosaic.version = 11 : i64} {
  func.func @_attention_kernel(%arg0: i32, %arg1: i32, %arg2: memref<1x16x32xf32, #tpu.memory_space<vmem>>, %arg3: memref<32x96xf32, #tpu.memory_space<vmem>>, %arg4: memref<32x32xf32, #tpu.memory_space<vmem>>, %arg5: memref<1x32xf32, #tpu.memory_space<vmem>>, %arg6: memref<1x8x32xf32, #tpu.memory_space<vmem>>, %arg7: memref<16x32xf32, #tpu.memory_space<vmem>>, %arg8: memref<32x16xf32, #tpu.memory_space<vmem>>, %arg9: memref<16x32xf32, #tpu.memory_space<vmem>>, %arg10: memref<8x32xf32, #tpu.memory_space<vmem>>) attributes {dimension_semantics = [#tpu.dimension_semantics<parallel>, #tpu.dimension_semantics<arbitrary>], iteration_bounds = array<i64: 2, 2>, scalar_prefetch = 0 : i64, scratch_operands = 4 : i64, tpu.core_type = #tpu.core_type<tc>, window_params = [{transform_indices = @transform_0, window_bounds = array<i64: 1, 16, 32>}, {pipeline_mode = #tpu.pipeline_mode<synchronous>, transform_indices = @transform_1, window_bounds = array<i64: 32, 96>}, {pipeline_mode = #tpu.pipeline_mode<synchronous>, transform_indices = @transform_2, window_bounds = array<i64: 32, 32>}, {pipeline_mode = #tpu.pipeline_mode<synchronous>, transform_indices = @transform_3, window_bounds = array<i64: 1, 32>}, {transform_indices = @transform_4, window_bounds = array<i64: 1, 8, 32>}]} {
    %c0_i32 = arith.constant 0 : i32
    %0 = arith.cmpi eq, %arg1, %c0_i32 : i32
    %1 = arith.extui %0 : i1 to i32
    %c0_i32_0 = arith.constant 0 : i32
    %2 = arith.cmpi ne, %1, %c0_i32_0 : i32
    scf.if %2 {
      %c0_90 = arith.constant 0 : index
      %c0_91 = arith.constant 0 : index
      %c0_92 = arith.constant 0 : index
      %150 = vector.load %arg2[%c0_90, %c0_91, %c0_92] : memref<1x16x32xf32, #tpu.memory_space<vmem>>, vector<1x16x32xf32>
      %151 = vector.shape_cast %150 : vector<1x16x32xf32> to vector<16x32xf32>
      %c0_93 = arith.constant 0 : index
      %c0_94 = arith.constant 0 : index
      %152 = vector.load %arg3[%c0_93, %c0_94] : memref<32x96xf32, #tpu.memory_space<vmem>>, vector<32x96xf32>
      %cst_95 = arith.constant dense<0.000000e+00> : vector<16x96xf32>
      %153 = tpu.matmul %151, %152, %cst_95 {dimension_numbers = #tpu.dot_dimension_numbers<[1], [0], [0], [1], [0, 0, 1, 1], [], []>} : vector<16x32xf32>, vector<32x96xf32>, vector<16x96xf32> -> vector<16x96xf32>
      %154 = vector.extract_strided_slice %153 {offsets = [0, 0], sizes = [16, 32], strides = [1, 1]} : vector<16x96xf32> to vector<16x32xf32>
      %c0_96 = arith.constant 0 : index
      %c0_97 = arith.constant 0 : index
      %155 = vector.load %arg7[%c0_96, %c0_97] : memref<16x32xf32, #tpu.memory_space<vmem>>, vector<16x32xf32>
      tpu.vector_store %arg7[%c0_96, %c0_97], %154 {strides = array<i32>} : memref<16x32xf32, #tpu.memory_space<vmem>>, vector<16x32xf32>,
      %156 = vector.extract_strided_slice %153 {offsets = [0, 64], sizes = [16, 32], strides = [1, 1]} : vector<16x96xf32> to vector<16x32xf32>
      %c0_98 = arith.constant 0 : index
      %c0_99 = arith.constant 0 : index
      %157 = vector.load %arg9[%c0_98, %c0_99] : memref<16x32xf32, #tpu.memory_space<vmem>>, vector<16x32xf32>
      tpu.vector_store %arg9[%c0_98, %c0_99], %156 {strides = array<i32>} : memref<16x32xf32, #tpu.memory_space<vmem>>, vector<16x32xf32>,
      %158 = vector.extract_strided_slice %153 {offsets = [0, 32], sizes = [16, 32], strides = [1, 1]} : vector<16x96xf32> to vector<16x32xf32>
      %159 = tpu.transpose %158, [1, 0] : vector<16x32xf32> -> vector<32x16xf32>
      %c0_100 = arith.constant 0 : index
      %c0_101 = arith.constant 0 : index
      %160 = vector.load %arg8[%c0_100, %c0_101] : memref<32x16xf32, #tpu.memory_space<vmem>>, vector<32x16xf32>
      tpu.vector_store %arg8[%c0_100, %c0_101], %159 {strides = array<i32>} : memref<32x16xf32, #tpu.memory_space<vmem>>, vector<32x16xf32>,
    } else {
    }
    %c8_i32 = arith.constant 8 : i32
    %3 = arith.muli %arg1, %c8_i32 : i32
    %4 = tpu.assume_multiple %3, 8 : i32
    %5 = arith.index_cast %4 : i32 to index
    %c0 = arith.constant 0 : index
    %6 = vector.load %arg7[%5, %c0] : memref<16x32xf32, #tpu.memory_space<vmem>>, vector<8x4xf32>
    %c0_1 = arith.constant 0 : index
    %c0_2 = arith.constant 0 : index
    %7 = vector.load %arg8[%c0_1, %c0_2] : memref<32x16xf32, #tpu.memory_space<vmem>>, vector<4x16xf32>
    %c0_3 = arith.constant 0 : index
    %c0_4 = arith.constant 0 : index
    %8 = vector.load %arg9[%c0_3, %c0_4] : memref<16x32xf32, #tpu.memory_space<vmem>>, vector<16x4xf32>
    %cst = arith.constant dense<0.000000e+00> : vector<8x16xf32>
    %9 = tpu.matmul %6, %7, %cst {dimension_numbers = #tpu.dot_dimension_numbers<[1], [0], [0], [1], [0, 0, 1, 1], [], []>} : vector<8x4xf32>, vector<4x16xf32>, vector<8x16xf32> -> vector<8x16xf32>
    %cst_5 = arith.constant dense<0xFF800000> : vector<8xf32>
    %10 = vector.multi_reduction <maximumf>, %9, %cst_5 [1] : vector<8x16xf32> to vector<8xf32>
    %11 = vector.shape_cast %10 : vector<8xf32> to vector<8x1xf32>
    %12 = vector.broadcast %11 : vector<8x1xf32> to vector<8x16xf32>
    %13 = arith.subf %9, %12 : vector<8x16xf32>
    %14 = math.exp %13 : vector<8x16xf32>
    %cst_6 = arith.constant dense<0.000000e+00> : vector<8xf32>
    %15 = vector.multi_reduction <add>, %14, %cst_6 [1] : vector<8x16xf32> to vector<8xf32>
    %16 = vector.shape_cast %15 : vector<8xf32> to vector<8x1xf32>
    %cst_7 = arith.constant dense<0.000000e+00> : vector<8x4xf32>
    %17 = tpu.matmul %14, %8, %cst_7 {dimension_numbers = #tpu.dot_dimension_numbers<[1], [0], [0], [1], [0, 0, 1, 1], [], []>} : vector<8x16xf32>, vector<16x4xf32>, vector<8x4xf32> -> vector<8x4xf32>
    %18 = tpu.reciprocal %16 {approx = true} : vector<8x1xf32> -> vector<8x1xf32>
    %19 = vector.broadcast %18 : vector<8x1xf32> to vector<8x4xf32>
    %20 = arith.mulf %17, %19 : vector<8x4xf32>
    %c0_8 = arith.constant 0 : index
    %c0_9 = arith.constant 0 : index
    %21 = vector.load %arg10[%c0_8, %c0_9] : memref<8x32xf32, #tpu.memory_space<vmem>>, vector<8x4xf32>
    tpu.vector_store %arg10[%c0_8, %c0_9], %20 {strides = array<i32>} : memref<8x32xf32, #tpu.memory_space<vmem>>, vector<8x4xf32>,
    %22 = arith.index_cast %4 : i32 to index
    %c4 = arith.constant 4 : index
    %23 = vector.load %arg7[%22, %c4] : memref<16x32xf32, #tpu.memory_space<vmem>>, vector<8x4xf32>
    %c4_10 = arith.constant 4 : index
    %c0_11 = arith.constant 0 : index
    %24 = vector.load %arg8[%c4_10, %c0_11] : memref<32x16xf32, #tpu.memory_space<vmem>>, vector<4x16xf32>
    %c0_12 = arith.constant 0 : index
    %c4_13 = arith.constant 4 : index
    %25 = vector.load %arg9[%c0_12, %c4_13] : memref<16x32xf32, #tpu.memory_space<vmem>>, vector<16x4xf32>
    %cst_14 = arith.constant dense<0.000000e+00> : vector<8x16xf32>
    %26 = tpu.matmul %23, %24, %cst_14 {dimension_numbers = #tpu.dot_dimension_numbers<[1], [0], [0], [1], [0, 0, 1, 1], [], []>} : vector<8x4xf32>, vector<4x16xf32>, vector<8x16xf32> -> vector<8x16xf32>
    %cst_15 = arith.constant dense<0xFF800000> : vector<8xf32>
    %27 = vector.multi_reduction <maximumf>, %26, %cst_15 [1] : vector<8x16xf32> to vector<8xf32>
    %28 = vector.shape_cast %27 : vector<8xf32> to vector<8x1xf32>
    %29 = vector.broadcast %28 : vector<8x1xf32> to vector<8x16xf32>
    %30 = arith.subf %26, %29 : vector<8x16xf32>
    %31 = math.exp %30 : vector<8x16xf32>
    %cst_16 = arith.constant dense<0.000000e+00> : vector<8xf32>
    %32 = vector.multi_reduction <add>, %31, %cst_16 [1] : vector<8x16xf32> to vector<8xf32>
    %33 = vector.shape_cast %32 : vector<8xf32> to vector<8x1xf32>
    %cst_17 = arith.constant dense<0.000000e+00> : vector<8x4xf32>
    %34 = tpu.matmul %31, %25, %cst_17 {dimension_numbers = #tpu.dot_dimension_numbers<[1], [0], [0], [1], [0, 0, 1, 1], [], []>} : vector<8x16xf32>, vector<16x4xf32>, vector<8x4xf32> -> vector<8x4xf32>
    %35 = tpu.reciprocal %33 {approx = true} : vector<8x1xf32> -> vector<8x1xf32>
    %36 = vector.broadcast %35 : vector<8x1xf32> to vector<8x4xf32>
    %37 = arith.mulf %34, %36 : vector<8x4xf32>
    %c0_18 = arith.constant 0 : index
    %c4_19 = arith.constant 4 : index
    %38 = vector.load %arg10[%c0_18, %c4_19] : memref<8x32xf32, #tpu.memory_space<vmem>>, vector<8x4xf32>
    tpu.vector_store %arg10[%c0_18, %c4_19], %37 {strides = array<i32>} : memref<8x32xf32, #tpu.memory_space<vmem>>, vector<8x4xf32>,
    %39 = arith.index_cast %4 : i32 to index
    %c8 = arith.constant 8 : index
    %40 = vector.load %arg7[%39, %c8] : memref<16x32xf32, #tpu.memory_space<vmem>>, vector<8x4xf32>
    %c8_20 = arith.constant 8 : index
    %c0_21 = arith.constant 0 : index
    %41 = vector.load %arg8[%c8_20, %c0_21] : memref<32x16xf32, #tpu.memory_space<vmem>>, vector<4x16xf32>
    %c0_22 = arith.constant 0 : index
    %c8_23 = arith.constant 8 : index
    %42 = vector.load %arg9[%c0_22, %c8_23] : memref<16x32xf32, #tpu.memory_space<vmem>>, vector<16x4xf32>
    %cst_24 = arith.constant dense<0.000000e+00> : vector<8x16xf32>
    %43 = tpu.matmul %40, %41, %cst_24 {dimension_numbers = #tpu.dot_dimension_numbers<[1], [0], [0], [1], [0, 0, 1, 1], [], []>} : vector<8x4xf32>, vector<4x16xf32>, vector<8x16xf32> -> vector<8x16xf32>
    %cst_25 = arith.constant dense<0xFF800000> : vector<8xf32>
    %44 = vector.multi_reduction <maximumf>, %43, %cst_25 [1] : vector<8x16xf32> to vector<8xf32>
    %45 = vector.shape_cast %44 : vector<8xf32> to vector<8x1xf32>
    %46 = vector.broadcast %45 : vector<8x1xf32> to vector<8x16xf32>
    %47 = arith.subf %43, %46 : vector<8x16xf32>
    %48 = math.exp %47 : vector<8x16xf32>
    %cst_26 = arith.constant dense<0.000000e+00> : vector<8xf32>
    %49 = vector.multi_reduction <add>, %48, %cst_26 [1] : vector<8x16xf32> to vector<8xf32>
    %50 = vector.shape_cast %49 : vector<8xf32> to vector<8x1xf32>
    %cst_27 = arith.constant dense<0.000000e+00> : vector<8x4xf32>
    %51 = tpu.matmul %48, %42, %cst_27 {dimension_numbers = #tpu.dot_dimension_numbers<[1], [0], [0], [1], [0, 0, 1, 1], [], []>} : vector<8x16xf32>, vector<16x4xf32>, vector<8x4xf32> -> vector<8x4xf32>
    %52 = tpu.reciprocal %50 {approx = true} : vector<8x1xf32> -> vector<8x1xf32>
    %53 = vector.broadcast %52 : vector<8x1xf32> to vector<8x4xf32>
    %54 = arith.mulf %51, %53 : vector<8x4xf32>
    %c0_28 = arith.constant 0 : index
    %c8_29 = arith.constant 8 : index
    %55 = vector.load %arg10[%c0_28, %c8_29] : memref<8x32xf32, #tpu.memory_space<vmem>>, vector<8x4xf32>
    tpu.vector_store %arg10[%c0_28, %c8_29], %54 {strides = array<i32>} : memref<8x32xf32, #tpu.memory_space<vmem>>, vector<8x4xf32>,
    %56 = arith.index_cast %4 : i32 to index
    %c12 = arith.constant 12 : index
    %57 = vector.load %arg7[%56, %c12] : memref<16x32xf32, #tpu.memory_space<vmem>>, vector<8x4xf32>
    %c12_30 = arith.constant 12 : index
    %c0_31 = arith.constant 0 : index
    %58 = vector.load %arg8[%c12_30, %c0_31] : memref<32x16xf32, #tpu.memory_space<vmem>>, vector<4x16xf32>
    %c0_32 = arith.constant 0 : index
    %c12_33 = arith.constant 12 : index
    %59 = vector.load %arg9[%c0_32, %c12_33] : memref<16x32xf32, #tpu.memory_space<vmem>>, vector<16x4xf32>
    %cst_34 = arith.constant dense<0.000000e+00> : vector<8x16xf32>
    %60 = tpu.matmul %57, %58, %cst_34 {dimension_numbers = #tpu.dot_dimension_numbers<[1], [0], [0], [1], [0, 0, 1, 1], [], []>} : vector<8x4xf32>, vector<4x16xf32>, vector<8x16xf32> -> vector<8x16xf32>
    %cst_35 = arith.constant dense<0xFF800000> : vector<8xf32>
    %61 = vector.multi_reduction <maximumf>, %60, %cst_35 [1] : vector<8x16xf32> to vector<8xf32>
    %62 = vector.shape_cast %61 : vector<8xf32> to vector<8x1xf32>
    %63 = vector.broadcast %62 : vector<8x1xf32> to vector<8x16xf32>
    %64 = arith.subf %60, %63 : vector<8x16xf32>
    %65 = math.exp %64 : vector<8x16xf32>
    %cst_36 = arith.constant dense<0.000000e+00> : vector<8xf32>
    %66 = vector.multi_reduction <add>, %65, %cst_36 [1] : vector<8x16xf32> to vector<8xf32>
    %67 = vector.shape_cast %66 : vector<8xf32> to vector<8x1xf32>
    %cst_37 = arith.constant dense<0.000000e+00> : vector<8x4xf32>
    %68 = tpu.matmul %65, %59, %cst_37 {dimension_numbers = #tpu.dot_dimension_numbers<[1], [0], [0], [1], [0, 0, 1, 1], [], []>} : vector<8x16xf32>, vector<16x4xf32>, vector<8x4xf32> -> vector<8x4xf32>
    %69 = tpu.reciprocal %67 {approx = true} : vector<8x1xf32> -> vector<8x1xf32>
    %70 = vector.broadcast %69 : vector<8x1xf32> to vector<8x4xf32>
    %71 = arith.mulf %68, %70 : vector<8x4xf32>
    %c0_38 = arith.constant 0 : index
    %c12_39 = arith.constant 12 : index
    %72 = vector.load %arg10[%c0_38, %c12_39] : memref<8x32xf32, #tpu.memory_space<vmem>>, vector<8x4xf32>
    tpu.vector_store %arg10[%c0_38, %c12_39], %71 {strides = array<i32>} : memref<8x32xf32, #tpu.memory_space<vmem>>, vector<8x4xf32>,
    %73 = arith.index_cast %4 : i32 to index
    %c16 = arith.constant 16 : index
    %74 = vector.load %arg7[%73, %c16] : memref<16x32xf32, #tpu.memory_space<vmem>>, vector<8x4xf32>
    %c16_40 = arith.constant 16 : index
    %c0_41 = arith.constant 0 : index
    %75 = vector.load %arg8[%c16_40, %c0_41] : memref<32x16xf32, #tpu.memory_space<vmem>>, vector<4x16xf32>
    %c0_42 = arith.constant 0 : index
    %c16_43 = arith.constant 16 : index
    %76 = vector.load %arg9[%c0_42, %c16_43] : memref<16x32xf32, #tpu.memory_space<vmem>>, vector<16x4xf32>
    %cst_44 = arith.constant dense<0.000000e+00> : vector<8x16xf32>
    %77 = tpu.matmul %74, %75, %cst_44 {dimension_numbers = #tpu.dot_dimension_numbers<[1], [0], [0], [1], [0, 0, 1, 1], [], []>} : vector<8x4xf32>, vector<4x16xf32>, vector<8x16xf32> -> vector<8x16xf32>
    %cst_45 = arith.constant dense<0xFF800000> : vector<8xf32>
    %78 = vector.multi_reduction <maximumf>, %77, %cst_45 [1] : vector<8x16xf32> to vector<8xf32>
    %79 = vector.shape_cast %78 : vector<8xf32> to vector<8x1xf32>
    %80 = vector.broadcast %79 : vector<8x1xf32> to vector<8x16xf32>
    %81 = arith.subf %77, %80 : vector<8x16xf32>
    %82 = math.exp %81 : vector<8x16xf32>
    %cst_46 = arith.constant dense<0.000000e+00> : vector<8xf32>
    %83 = vector.multi_reduction <add>, %82, %cst_46 [1] : vector<8x16xf32> to vector<8xf32>
    %84 = vector.shape_cast %83 : vector<8xf32> to vector<8x1xf32>
    %cst_47 = arith.constant dense<0.000000e+00> : vector<8x4xf32>
    %85 = tpu.matmul %82, %76, %cst_47 {dimension_numbers = #tpu.dot_dimension_numbers<[1], [0], [0], [1], [0, 0, 1, 1], [], []>} : vector<8x16xf32>, vector<16x4xf32>, vector<8x4xf32> -> vector<8x4xf32>
    %86 = tpu.reciprocal %84 {approx = true} : vector<8x1xf32> -> vector<8x1xf32>
    %87 = vector.broadcast %86 : vector<8x1xf32> to vector<8x4xf32>
    %88 = arith.mulf %85, %87 : vector<8x4xf32>
    %c0_48 = arith.constant 0 : index
    %c16_49 = arith.constant 16 : index
    %89 = vector.load %arg10[%c0_48, %c16_49] : memref<8x32xf32, #tpu.memory_space<vmem>>, vector<8x4xf32>
    tpu.vector_store %arg10[%c0_48, %c16_49], %88 {strides = array<i32>} : memref<8x32xf32, #tpu.memory_space<vmem>>, vector<8x4xf32>,
    %90 = arith.index_cast %4 : i32 to index
    %c20 = arith.constant 20 : index
    %91 = vector.load %arg7[%90, %c20] : memref<16x32xf32, #tpu.memory_space<vmem>>, vector<8x4xf32>
    %c20_50 = arith.constant 20 : index
    %c0_51 = arith.constant 0 : index
    %92 = vector.load %arg8[%c20_50, %c0_51] : memref<32x16xf32, #tpu.memory_space<vmem>>, vector<4x16xf32>
    %c0_52 = arith.constant 0 : index
    %c20_53 = arith.constant 20 : index
    %93 = vector.load %arg9[%c0_52, %c20_53] : memref<16x32xf32, #tpu.memory_space<vmem>>, vector<16x4xf32>
    %cst_54 = arith.constant dense<0.000000e+00> : vector<8x16xf32>
    %94 = tpu.matmul %91, %92, %cst_54 {dimension_numbers = #tpu.dot_dimension_numbers<[1], [0], [0], [1], [0, 0, 1, 1], [], []>} : vector<8x4xf32>, vector<4x16xf32>, vector<8x16xf32> -> vector<8x16xf32>
    %cst_55 = arith.constant dense<0xFF800000> : vector<8xf32>
    %95 = vector.multi_reduction <maximumf>, %94, %cst_55 [1] : vector<8x16xf32> to vector<8xf32>
    %96 = vector.shape_cast %95 : vector<8xf32> to vector<8x1xf32>
    %97 = vector.broadcast %96 : vector<8x1xf32> to vector<8x16xf32>
    %98 = arith.subf %94, %97 : vector<8x16xf32>
    %99 = math.exp %98 : vector<8x16xf32>
    %cst_56 = arith.constant dense<0.000000e+00> : vector<8xf32>
    %100 = vector.multi_reduction <add>, %99, %cst_56 [1] : vector<8x16xf32> to vector<8xf32>
    %101 = vector.shape_cast %100 : vector<8xf32> to vector<8x1xf32>
    %cst_57 = arith.constant dense<0.000000e+00> : vector<8x4xf32>
    %102 = tpu.matmul %99, %93, %cst_57 {dimension_numbers = #tpu.dot_dimension_numbers<[1], [0], [0], [1], [0, 0, 1, 1], [], []>} : vector<8x16xf32>, vector<16x4xf32>, vector<8x4xf32> -> vector<8x4xf32>
    %103 = tpu.reciprocal %101 {approx = true} : vector<8x1xf32> -> vector<8x1xf32>
    %104 = vector.broadcast %103 : vector<8x1xf32> to vector<8x4xf32>
    %105 = arith.mulf %102, %104 : vector<8x4xf32>
    %c0_58 = arith.constant 0 : index
    %c20_59 = arith.constant 20 : index
    %106 = vector.load %arg10[%c0_58, %c20_59] : memref<8x32xf32, #tpu.memory_space<vmem>>, vector<8x4xf32>
    tpu.vector_store %arg10[%c0_58, %c20_59], %105 {strides = array<i32>} : memref<8x32xf32, #tpu.memory_space<vmem>>, vector<8x4xf32>,
    %107 = arith.index_cast %4 : i32 to index
    %c24 = arith.constant 24 : index
    %108 = vector.load %arg7[%107, %c24] : memref<16x32xf32, #tpu.memory_space<vmem>>, vector<8x4xf32>
    %c24_60 = arith.constant 24 : index
    %c0_61 = arith.constant 0 : index
    %109 = vector.load %arg8[%c24_60, %c0_61] : memref<32x16xf32, #tpu.memory_space<vmem>>, vector<4x16xf32>
    %c0_62 = arith.constant 0 : index
    %c24_63 = arith.constant 24 : index
    %110 = vector.load %arg9[%c0_62, %c24_63] : memref<16x32xf32, #tpu.memory_space<vmem>>, vector<16x4xf32>
    %cst_64 = arith.constant dense<0.000000e+00> : vector<8x16xf32>
    %111 = tpu.matmul %108, %109, %cst_64 {dimension_numbers = #tpu.dot_dimension_numbers<[1], [0], [0], [1], [0, 0, 1, 1], [], []>} : vector<8x4xf32>, vector<4x16xf32>, vector<8x16xf32> -> vector<8x16xf32>
    %cst_65 = arith.constant dense<0xFF800000> : vector<8xf32>
    %112 = vector.multi_reduction <maximumf>, %111, %cst_65 [1] : vector<8x16xf32> to vector<8xf32>
    %113 = vector.shape_cast %112 : vector<8xf32> to vector<8x1xf32>
    %114 = vector.broadcast %113 : vector<8x1xf32> to vector<8x16xf32>
    %115 = arith.subf %111, %114 : vector<8x16xf32>
    %116 = math.exp %115 : vector<8x16xf32>
    %cst_66 = arith.constant dense<0.000000e+00> : vector<8xf32>
    %117 = vector.multi_reduction <add>, %116, %cst_66 [1] : vector<8x16xf32> to vector<8xf32>
    %118 = vector.shape_cast %117 : vector<8xf32> to vector<8x1xf32>
    %cst_67 = arith.constant dense<0.000000e+00> : vector<8x4xf32>
    %119 = tpu.matmul %116, %110, %cst_67 {dimension_numbers = #tpu.dot_dimension_numbers<[1], [0], [0], [1], [0, 0, 1, 1], [], []>} : vector<8x16xf32>, vector<16x4xf32>, vector<8x4xf32> -> vector<8x4xf32>
    %120 = tpu.reciprocal %118 {approx = true} : vector<8x1xf32> -> vector<8x1xf32>
    %121 = vector.broadcast %120 : vector<8x1xf32> to vector<8x4xf32>
    %122 = arith.mulf %119, %121 : vector<8x4xf32>
    %c0_68 = arith.constant 0 : index
    %c24_69 = arith.constant 24 : index
    %123 = vector.load %arg10[%c0_68, %c24_69] : memref<8x32xf32, #tpu.memory_space<vmem>>, vector<8x4xf32>
    tpu.vector_store %arg10[%c0_68, %c24_69], %122 {strides = array<i32>} : memref<8x32xf32, #tpu.memory_space<vmem>>, vector<8x4xf32>,
    %124 = arith.index_cast %4 : i32 to index
    %c28 = arith.constant 28 : index
    %125 = vector.load %arg7[%124, %c28] : memref<16x32xf32, #tpu.memory_space<vmem>>, vector<8x4xf32>
    %c28_70 = arith.constant 28 : index
    %c0_71 = arith.constant 0 : index
    %126 = vector.load %arg8[%c28_70, %c0_71] : memref<32x16xf32, #tpu.memory_space<vmem>>, vector<4x16xf32>
    %c0_72 = arith.constant 0 : index
    %c28_73 = arith.constant 28 : index
    %127 = vector.load %arg9[%c0_72, %c28_73] : memref<16x32xf32, #tpu.memory_space<vmem>>, vector<16x4xf32>
    %cst_74 = arith.constant dense<0.000000e+00> : vector<8x16xf32>
    %128 = tpu.matmul %125, %126, %cst_74 {dimension_numbers = #tpu.dot_dimension_numbers<[1], [0], [0], [1], [0, 0, 1, 1], [], []>} : vector<8x4xf32>, vector<4x16xf32>, vector<8x16xf32> -> vector<8x16xf32>
    %cst_75 = arith.constant dense<0xFF800000> : vector<8xf32>
    %129 = vector.multi_reduction <maximumf>, %128, %cst_75 [1] : vector<8x16xf32> to vector<8xf32>
    %130 = vector.shape_cast %129 : vector<8xf32> to vector<8x1xf32>
    %131 = vector.broadcast %130 : vector<8x1xf32> to vector<8x16xf32>
    %132 = arith.subf %128, %131 : vector<8x16xf32>
    %133 = math.exp %132 : vector<8x16xf32>
    %cst_76 = arith.constant dense<0.000000e+00> : vector<8xf32>
    %134 = vector.multi_reduction <add>, %133, %cst_76 [1] : vector<8x16xf32> to vector<8xf32>
    %135 = vector.shape_cast %134 : vector<8xf32> to vector<8x1xf32>
    %cst_77 = arith.constant dense<0.000000e+00> : vector<8x4xf32>
    %136 = tpu.matmul %133, %127, %cst_77 {dimension_numbers = #tpu.dot_dimension_numbers<[1], [0], [0], [1], [0, 0, 1, 1], [], []>} : vector<8x16xf32>, vector<16x4xf32>, vector<8x4xf32> -> vector<8x4xf32>
    %137 = tpu.reciprocal %135 {approx = true} : vector<8x1xf32> -> vector<8x1xf32>
    %138 = vector.broadcast %137 : vector<8x1xf32> to vector<8x4xf32>
    %139 = arith.mulf %136, %138 : vector<8x4xf32>
    %c0_78 = arith.constant 0 : index
    %c28_79 = arith.constant 28 : index
    %140 = vector.load %arg10[%c0_78, %c28_79] : memref<8x32xf32, #tpu.memory_space<vmem>>, vector<8x4xf32>
    tpu.vector_store %arg10[%c0_78, %c28_79], %139 {strides = array<i32>} : memref<8x32xf32, #tpu.memory_space<vmem>>, vector<8x4xf32>,
    %c0_80 = arith.constant 0 : index
    %c0_81 = arith.constant 0 : index
    %141 = vector.load %arg10[%c0_80, %c0_81] : memref<8x32xf32, #tpu.memory_space<vmem>>, vector<8x32xf32>
    %c0_82 = arith.constant 0 : index
    %c0_83 = arith.constant 0 : index
    %142 = vector.load %arg4[%c0_82, %c0_83] : memref<32x32xf32, #tpu.memory_space<vmem>>, vector<32x32xf32>
    %cst_84 = arith.constant dense<0.000000e+00> : vector<8x32xf32>
    %143 = tpu.matmul %141, %142, %cst_84 {dimension_numbers = #tpu.dot_dimension_numbers<[1], [0], [0], [1], [0, 0, 1, 1], [], []>} : vector<8x32xf32>, vector<32x32xf32>, vector<8x32xf32> -> vector<8x32xf32>
    %c0_85 = arith.constant 0 : index
    %c0_86 = arith.constant 0 : index
    %144 = vector.load %arg5[%c0_85, %c0_86] : memref<1x32xf32, #tpu.memory_space<vmem>>, vector<1x32xf32>
    %145 = vector.broadcast %144 : vector<1x32xf32> to vector<8x32xf32>
    %146 = arith.addf %143, %145 : vector<8x32xf32>
    %c0_87 = arith.constant 0 : index
    %c0_88 = arith.constant 0 : index
    %c0_89 = arith.constant 0 : index
    %147 = vector.load %arg6[%c0_87, %c0_88, %c0_89] : memref<1x8x32xf32, #tpu.memory_space<vmem>>, vector<1x8x32xf32>
    %148 = vector.shape_cast %147 : vector<1x8x32xf32> to vector<8x32xf32>
    %149 = vector.shape_cast %146 : vector<8x32xf32> to vector<1x8x32xf32>
    tpu.vector_store %arg6[%c0_87, %c0_88, %c0_89], %149 {strides = array<i32>} : memref<1x8x32xf32, #tpu.memory_space<vmem>>, vector<1x8x32xf32>,
    return
  }
  func.func @transform_0(%arg0: i32, %arg1: i32) -> (i32, i32, i32) {
    %c0_i32 = arith.constant 0 : i32
    %c0_i32_0 = arith.constant 0 : i32
    %c0_i32_1 = arith.constant 0 : i32
    return %arg0, %c0_i32, %c0_i32_0 : i32, i32, i32
  }
  func.func @transform_1(%arg0: i32, %arg1: i32) -> (i32, i32) {
    %c0_i32 = arith.constant 0 : i32
    %c0_i32_0 = arith.constant 0 : i32
    %c0_i32_1 = arith.constant 0 : i32
    return %c0_i32, %c0_i32_0 : i32, i32
  }
  func.func @transform_2(%arg0: i32, %arg1: i32) -> (i32, i32) {
    %c0_i32 = arith.constant 0 : i32
    %c0_i32_0 = arith.constant 0 : i32
    %c0_i32_1 = arith.constant 0 : i32
    return %c0_i32, %c0_i32_0 : i32, i32
  }
  func.func @transform_3(%arg0: i32, %arg1: i32) -> (i32, i32) {
    %c0_i32 = arith.constant 0 : i32
    %c0_i32_0 = arith.constant 0 : i32
    %c0_i32_1 = arith.constant 0 : i32
    return %c0_i32, %c0_i32_0 : i32, i32
  }
  func.func @transform_4(%arg0: i32, %arg1: i32) -> (i32, i32, i32) {
    %c0_i32 = arith.constant 0 : i32
    %c0_i32_0 = arith.constant 0 : i32
    return %arg0, %arg1, %c0_i32 : i32, i32, i32
  }
}

module attributes {stable_mosaic.version = 11 : i64} {
  func.func @_attention_kernel(%arg0: i32, %arg1: i32, %arg2: memref<1x16x32xf32, #tpu.memory_space<vmem>>, %arg3: memref<32x96xf32, #tpu.memory_space<vmem>>, %arg4: memref<32x32xf32, #tpu.memory_space<vmem>>, %arg5: memref<1x32xf32, #tpu.memory_space<vmem>>, %arg6: memref<1x8x32xf32, #tpu.memory_space<vmem>>, %arg7: memref<16x32xf32, #tpu.memory_space<vmem>>, %arg8: memref<32x16xf32, #tpu.memory_space<vmem>>, %arg9: memref<16x32xf32, #tpu.memory_space<vmem>>, %arg10: memref<8x32xf32, #tpu.memory_space<vmem>>) attributes {dimension_semantics = [#tpu.dimension_semantics<parallel>, #tpu.dimension_semantics<arbitrary>], iteration_bounds = array<i64: 2, 2>, scalar_prefetch = 0 : i64, scratch_operands = 4 : i64, tpu.core_type = #tpu.core_type<tc>, window_params = [{transform_indices = @transform_0, window_bounds = array<i64: 1, 16, 32>}, {pipeline_mode = #tpu.pipeline_mode<synchronous>, transform_indices = @transform_1, window_bounds = array<i64: 32, 96>}, {pipeline_mode = #tpu.pipeline_mode<synchronous>, transform_indices = @transform_2, window_bounds = array<i64: 32, 32>}, {pipeline_mode = #tpu.pipeline_mode<synchronous>, transform_indices = @transform_3, window_bounds = array<i64: 1, 32>}, {transform_indices = @transform_4, window_bounds = array<i64: 1, 8, 32>}]} {
    %c0_i32 = arith.constant 0 : i32
    %0 = arith.cmpi eq, %arg1, %c0_i32 : i32
    %1 = arith.extui %0 : i1 to i32
    %c0_i32_0 = arith.constant 0 : i32
    %2 = arith.cmpi ne, %1, %c0_i32_0 : i32
    scf.if %2 {
      %c0_90 = arith.constant 0 : index
      %c0_91 = arith.constant 0 : index
      %c0_92 = arith.constant 0 : index
      %150 = vector.load %arg2[%c0_90, %c0_91, %c0_92] : memref<1x16x32xf32, #tpu.memory_space<vmem>>, vector<1x16x32xf32>
      %151 = vector.shape_cast %150 : vector<1x16x32xf32> to vector<16x32xf32>
      %c0_93 = arith.constant 0 : index
      %c0_94 = arith.constant 0 : index
      %152 = vector.load %arg3[%c0_93, %c0_94] : memref<32x96xf32, #tpu.memory_space<vmem>>, vector<32x96xf32>
      %cst_95 = arith.constant dense<0.000000e+00> : vector<16x96xf32>
      %153 = tpu.matmul %151, %152, %cst_95 {dimension_numbers = #tpu.dot_dimension_numbers<[1], [0], [0], [1], [0, 0, 1, 1], [], []>} : vector<16x32xf32>, vector<32x96xf32>, vector<16x96xf32> -> vector<16x96xf32>
      %154 = vector.extract_strided_slice %153 {offsets = [0, 0], sizes = [16, 32], strides = [1, 1]} : vector<16x96xf32> to vector<16x32xf32>
      %c0_96 = arith.constant 0 : index
      %c0_97 = arith.constant 0 : index
      %155 = vector.load %arg7[%c0_96, %c0_97] : memref<16x32xf32, #tpu.memory_space<vmem>>, vector<16x32xf32>
      tpu.vector_store %arg7[%c0_96, %c0_97], %154 {strides = array<i32>} : memref<16x32xf32, #tpu.memory_space<vmem>>, vector<16x32xf32>,
      %156 = vector.extract_strided_slice %153 {offsets = [0, 64], sizes = [16, 32], strides = [1, 1]} : vector<16x96xf32> to vector<16x32xf32>
      %c0_98 = arith.constant 0 : index
      %c0_99 = arith.constant 0 : index
      %157 = vector.load %arg9[%c0_98, %c0_99] : memref<16x32xf32, #tpu.memory_space<vmem>>, vector<16x32xf32>
      tpu.vector_store %arg9[%c0_98, %c0_99], %156 {strides = array<i32>} : memref<16x32xf32, #tpu.memory_space<vmem>>, vector<16x32xf32>,
      %158 = vector.extract_strided_slice %153 {offsets = [0, 32], sizes = [16, 32], strides = [1, 1]} : vector<16x96xf32> to vector<16x32xf32>
      %159 = tpu.transpose %158, [1, 0] : vector<16x32xf32> -> vector<32x16xf32>
      %c0_100 = arith.constant 0 : index
      %c0_101 = arith.constant 0 : index
      %160 = vector.load %arg8[%c0_100, %c0_101] : memref<32x16xf32, #tpu.memory_space<vmem>>, vector<32x16xf32>
      tpu.vector_store %arg8[%c0_100, %c0_101], %159 {strides = array<i32>} : memref<32x16xf32, #tpu.memory_space<vmem>>, vector<32x16xf32>,
    } else {
    }
    %c8_i32 = arith.constant 8 : i32
    %3 = arith.muli %arg1, %c8_i32 : i32
    %4 = tpu.assume_multiple %3, 8 : i32
    %5 = arith.index_cast %4 : i32 to index
    %c0 = arith.constant 0 : index
    %6 = vector.load %arg7[%5, %c0] : memref<16x32xf32, #tpu.memory_space<vmem>>, vector<8x4xf32>
    %c0_1 = arith.constant 0 : index
    %c0_2 = arith.constant 0 : index
    %7 = vector.load %arg8[%c0_1, %c0_2] : memref<32x16xf32, #tpu.memory_space<vmem>>, vector<4x16xf32>
    %c0_3 = arith.constant 0 : index
    %c0_4 = arith.constant 0 : index
    %8 = vector.load %arg9[%c0_3, %c0_4] : memref<16x32xf32, #tpu.memory_space<vmem>>, vector<16x4xf32>
    %cst = arith.constant dense<0.000000e+00> : vector<8x16xf32>
    %9 = tpu.matmul %6, %7, %cst {dimension_numbers = #tpu.dot_dimension_numbers<[1], [0], [0], [1], [0, 0, 1, 1], [], []>} : vector<8x4xf32>, vector<4x16xf32>, vector<8x16xf32> -> vector<8x16xf32>
    %cst_5 = arith.constant dense<0xFF800000> : vector<8xf32>
    %10 = vector.multi_reduction <maximumf>, %9, %cst_5 [1] : vector<8x16xf32> to vector<8xf32>
    %11 = vector.shape_cast %10 : vector<8xf32> to vector<8x1xf32>
    %12 = vector.broadcast %11 : vector<8x1xf32> to vector<8x16xf32>
    %13 = arith.subf %9, %12 : vector<8x16xf32>
    %14 = math.exp %13 : vector<8x16xf32>
    %cst_6 = arith.constant dense<0.000000e+00> : vector<8xf32>
    %15 = vector.multi_reduction <add>, %14, %cst_6 [1] : vector<8x16xf32> to vector<8xf32>
    %16 = vector.shape_cast %15 : vector<8xf32> to vector<8x1xf32>
    %cst_7 = arith.constant dense<0.000000e+00> : vector<8x4xf32>
    %17 = tpu.matmul %14, %8, %cst_7 {dimension_numbers = #tpu.dot_dimension_numbers<[1], [0], [0], [1], [0, 0, 1, 1], [], []>} : vector<8x16xf32>, vector<16x4xf32>, vector<8x4xf32> -> vector<8x4xf32>
    %18 = tpu.reciprocal %16 {approx = true} : vector<8x1xf32> -> vector<8x1xf32>
    %19 = vector.broadcast %18 : vector<8x1xf32> to vector<8x4xf32>
    %20 = arith.mulf %17, %19 : vector<8x4xf32>
    %c0_8 = arith.constant 0 : index
    %c0_9 = arith.constant 0 : index
    %21 = vector.load %arg10[%c0_8, %c0_9] : memref<8x32xf32, #tpu.memory_space<vmem>>, vector<8x4xf32>
    tpu.vector_store %arg10[%c0_8, %c0_9], %20 {strides = array<i32>} : memref<8x32xf32, #tpu.memory_space<vmem>>, vector<8x4xf32>,
    %22 = arith.index_cast %4 : i32 to index
    %c4 = arith.constant 4 : index
    %23 = vector.load %arg7[%22, %c4] : memref<16x32xf32, #tpu.memory_space<vmem>>, vector<8x4xf32>
    %c4_10 = arith.constant 4 : index
    %c0_11 = arith.constant 0 : index
    %24 = vector.load %arg8[%c4_10, %c0_11] : memref<32x16xf32, #tpu.memory_space<vmem>>, vector<4x16xf32>
    %c0_12 = arith.constant 0 : index
    %c4_13 = arith.constant 4 : index
    %25 = vector.load %arg9[%c0_12, %c4_13] : memref<16x32xf32, #tpu.memory_space<vmem>>, vector<16x4xf32>
    %cst_14 = arith.constant dense<0.000000e+00> : vector<8x16xf32>
    %26 = tpu.matmul %23, %24, %cst_14 {dimension_numbers = #tpu.dot_dimension_numbers<[1], [0], [0], [1], [0, 0, 1, 1], [], []>} : vector<8x4xf32>, vector<4x16xf32>, vector<8x16xf32> -> vector<8x16xf32>
    %cst_15 = arith.constant dense<0xFF800000> : vector<8xf32>
    %27 = vector.multi_reduction <maximumf>, %26, %cst_15 [1] : vector<8x16xf32> to vector<8xf32>
    %28 = vector.shape_cast %27 : vector<8xf32> to vector<8x1xf32>
    %29 = vector.broadcast %28 : vector<8x1xf32> to vector<8x16xf32>
    %30 = arith.subf %26, %29 : vector<8x16xf32>
    %31 = math.exp %30 : vector<8x16xf32>
    %cst_16 = arith.constant dense<0.000000e+00> : vector<8xf32>
    %32 = vector.multi_reduction <add>, %31, %cst_16 [1] : vector<8x16xf32> to vector<8xf32>
    %33 = vector.shape_cast %32 : vector<8xf32> to vector<8x1xf32>
    %cst_17 = arith.constant dense<0.000000e+00> : vector<8x4xf32>
    %34 = tpu.matmul %31, %25, %cst_17 {dimension_numbers = #tpu.dot_dimension_numbers<[1], [0], [0], [1], [0, 0, 1, 1], [], []>} : vector<8x16xf32>, vector<16x4xf32>, vector<8x4xf32> -> vector<8x4xf32>
    %35 = tpu.reciprocal %33 {approx = true} : vector<8x1xf32> -> vector<8x1xf32>
    %36 = vector.broadcast %35 : vector<8x1xf32> to vector<8x4xf32>
    %37 = arith.mulf %34, %36 : vector<8x4xf32>
    %c0_18 = arith.constant 0 : index
    %c4_19 = arith.constant 4 : index
    %38 = vector.load %arg10[%c0_18, %c4_19] : memref<8x32xf32, #tpu.memory_space<vmem>>, vector<8x4xf32>
    tpu.vector_store %arg10[%c0_18, %c4_19], %37 {strides = array<i32>} : memref<8x32xf32, #tpu.memory_space<vmem>>, vector<8x4xf32>,
    %39 = arith.index_cast %4 : i32 to index
    %c8 = arith.constant 8 : index
    %40 = vector.load %arg7[%39, %c8] : memref<16x32xf32, #tpu.memory_space<vmem>>, vector<8x4xf32>
    %c8_20 = arith.constant 8 : index
    %c0_21 = arith.constant 0 : index
    %41 = vector.load %arg8[%c8_20, %c0_21] : memref<32x16xf32, #tpu.memory_space<vmem>>, vector<4x16xf32>
    %c0_22 = arith.constant 0 : index
    %c8_23 = arith.constant 8 : index
    %42 = vector.load %arg9[%c0_22, %c8_23] : memref<16x32xf32, #tpu.memory_space<vmem>>, vector<16x4xf32>
    %cst_24 = arith.constant dense<0.000000e+00> : vector<8x16xf32>
    %43 = tpu.matmul %40, %41, %cst_24 {dimension_numbers = #tpu.dot_dimension_numbers<[1], [0], [0], [1], [0, 0, 1, 1], [], []>} : vector<8x4xf32>, vector<4x16xf32>, vector<8x16xf32> -> vector<8x16xf32>
    %cst_25 = arith.constant dense<0xFF800000> : vector<8xf32>
    %44 = vector.multi_reduction <maximumf>, %43, %cst_25 [1] : vector<8x16xf32> to vector<8xf32>
    %45 = vector.shape_cast %44 : vector<8xf32> to vector<8x1xf32>
    %46 = vector.broadcast %45 : vector<8x1xf32> to vector<8x16xf32>
    %47 = arith.subf %43, %46 : vector<8x16xf32>
    %48 = math.exp %47 : vector<8x16xf32>
    %cst_26 = arith.constant dense<0.000000e+00> : vector<8xf32>
    %49 = vector.multi_reduction <add>, %48, %cst_26 [1] : vector<8x16xf32> to vector<8xf32>
    %50 = vector.shape_cast %49 : vector<8xf32> to vector<8x1xf32>
    %cst_27 = arith.constant dense<0.000000e+00> : vector<8x4xf32>
    %51 = tpu.matmul %48, %42, %cst_27 {dimension_numbers = #tpu.dot_dimension_numbers<[1], [0], [0], [1], [0, 0, 1, 1], [], []>} : vector<8x16xf32>, vector<16x4xf32>, vector<8x4xf32> -> vector<8x4xf32>
    %52 = tpu.reciprocal %50 {approx = true} : vector<8x1xf32> -> vector<8x1xf32>
    %53 = vector.broadcast %52 : vector<8x1xf32> to vector<8x4xf32>
    %54 = arith.mulf %51, %53 : vector<8x4xf32>
    %c0_28 = arith.constant 0 : index
    %c8_29 = arith.constant 8 : index
    %55 = vector.load %arg10[%c0_28, %c8_29] : memref<8x32xf32, #tpu.memory_space<vmem>>, vector<8x4xf32>
    tpu.vector_store %arg10[%c0_28, %c8_29], %54 {strides = array<i32>} : memref<8x32xf32, #tpu.memory_space<vmem>>, vector<8x4xf32>,
    %56 = arith.index_cast %4 : i32 to index
    %c12 = arith.constant 12 : index
    %57 = vector.load %arg7[%56, %c12] : memref<16x32xf32, #tpu.memory_space<vmem>>, vector<8x4xf32>
    %c12_30 = arith.constant 12 : index
    %c0_31 = arith.constant 0 : index
    %58 = vector.load %arg8[%c12_30, %c0_31] : memref<32x16xf32, #tpu.memory_space<vmem>>, vector<4x16xf32>
    %c0_32 = arith.constant 0 : index
    %c12_33 = arith.constant 12 : index
    %59 = vector.load %arg9[%c0_32, %c12_33] : memref<16x32xf32, #tpu.memory_space<vmem>>, vector<16x4xf32>
    %cst_34 = arith.constant dense<0.000000e+00> : vector<8x16xf32>
    %60 = tpu.matmul %57, %58, %cst_34 {dimension_numbers = #tpu.dot_dimension_numbers<[1], [0], [0], [1], [0, 0, 1, 1], [], []>} : vector<8x4xf32>, vector<4x16xf32>, vector<8x16xf32> -> vector<8x16xf32>
    %cst_35 = arith.constant dense<0xFF800000> : vector<8xf32>
    %61 = vector.multi_reduction <maximumf>, %60, %cst_35 [1] : vector<8x16xf32> to vector<8xf32>
    %62 = vector.shape_cast %61 : vector<8xf32> to vector<8x1xf32>
    %63 = vector.broadcast %62 : vector<8x1xf32> to vector<8x16xf32>
    %64 = arith.subf %60, %63 : vector<8x16xf32>
    %65 = math.exp %64 : vector<8x16xf32>
    %cst_36 = arith.constant dense<0.000000e+00> : vector<8xf32>
    %66 = vector.multi_reduction <add>, %65, %cst_36 [1] : vector<8x16xf32> to vector<8xf32>
    %67 = vector.shape_cast %66 : vector<8xf32> to vector<8x1xf32>
    %cst_37 = arith.constant dense<0.000000e+00> : vector<8x4xf32>
    %68 = tpu.matmul %65, %59, %cst_37 {dimension_numbers = #tpu.dot_dimension_numbers<[1], [0], [0], [1], [0, 0, 1, 1], [], []>} : vector<8x16xf32>, vector<16x4xf32>, vector<8x4xf32> -> vector<8x4xf32>
    %69 = tpu.reciprocal %67 {approx = true} : vector<8x1xf32> -> vector<8x1xf32>
    %70 = vector.broadcast %69 : vector<8x1xf32> to vector<8x4xf32>
    %71 = arith.mulf %68, %70 : vector<8x4xf32>
    %c0_38 = arith.constant 0 : index
    %c12_39 = arith.constant 12 : index
    %72 = vector.load %arg10[%c0_38, %c12_39] : memref<8x32xf32, #tpu.memory_space<vmem>>, vector<8x4xf32>
    tpu.vector_store %arg10[%c0_38, %c12_39], %71 {strides = array<i32>} : memref<8x32xf32, #tpu.memory_space<vmem>>, vector<8x4xf32>,
    %73 = arith.index_cast %4 : i32 to index
    %c16 = arith.constant 16 : index
    %74 = vector.load %arg7[%73, %c16] : memref<16x32xf32, #tpu.memory_space<vmem>>, vector<8x4xf32>
    %c16_40 = arith.constant 16 : index
    %c0_41 = arith.constant 0 : index
    %75 = vector.load %arg8[%c16_40, %c0_41] : memref<32x16xf32, #tpu.memory_space<vmem>>, vector<4x16xf32>
    %c0_42 = arith.constant 0 : index
    %c16_43 = arith.constant 16 : index
    %76 = vector.load %arg9[%c0_42, %c16_43] : memref<16x32xf32, #tpu.memory_space<vmem>>, vector<16x4xf32>
    %cst_44 = arith.constant dense<0.000000e+00> : vector<8x16xf32>
    %77 = tpu.matmul %74, %75, %cst_44 {dimension_numbers = #tpu.dot_dimension_numbers<[1], [0], [0], [1], [0, 0, 1, 1], [], []>} : vector<8x4xf32>, vector<4x16xf32>, vector<8x16xf32> -> vector<8x16xf32>
    %cst_45 = arith.constant dense<0xFF800000> : vector<8xf32>
    %78 = vector.multi_reduction <maximumf>, %77, %cst_45 [1] : vector<8x16xf32> to vector<8xf32>
    %79 = vector.shape_cast %78 : vector<8xf32> to vector<8x1xf32>
    %80 = vector.broadcast %79 : vector<8x1xf32> to vector<8x16xf32>
    %81 = arith.subf %77, %80 : vector<8x16xf32>
    %82 = math.exp %81 : vector<8x16xf32>
    %cst_46 = arith.constant dense<0.000000e+00> : vector<8xf32>
    %83 = vector.multi_reduction <add>, %82, %cst_46 [1] : vector<8x16xf32> to vector<8xf32>
    %84 = vector.shape_cast %83 : vector<8xf32> to vector<8x1xf32>
    %cst_47 = arith.constant dense<0.000000e+00> : vector<8x4xf32>
    %85 = tpu.matmul %82, %76, %cst_47 {dimension_numbers = #tpu.dot_dimension_numbers<[1], [0], [0], [1], [0, 0, 1, 1], [], []>} : vector<8x16xf32>, vector<16x4xf32>, vector<8x4xf32> -> vector<8x4xf32>
    %86 = tpu.reciprocal %84 {approx = true} : vector<8x1xf32> -> vector<8x1xf32>
    %87 = vector.broadcast %86 : vector<8x1xf32> to vector<8x4xf32>
    %88 = arith.mulf %85, %87 : vector<8x4xf32>
    %c0_48 = arith.constant 0 : index
    %c16_49 = arith.constant 16 : index
    %89 = vector.load %arg10[%c0_48, %c16_49] : memref<8x32xf32, #tpu.memory_space<vmem>>, vector<8x4xf32>
    tpu.vector_store %arg10[%c0_48, %c16_49], %88 {strides = array<i32>} : memref<8x32xf32, #tpu.memory_space<vmem>>, vector<8x4xf32>,
    %90 = arith.index_cast %4 : i32 to index
    %c20 = arith.constant 20 : index
    %91 = vector.load %arg7[%90, %c20] : memref<16x32xf32, #tpu.memory_space<vmem>>, vector<8x4xf32>
    %c20_50 = arith.constant 20 : index
    %c0_51 = arith.constant 0 : index
    %92 = vector.load %arg8[%c20_50, %c0_51] : memref<32x16xf32, #tpu.memory_space<vmem>>, vector<4x16xf32>
    %c0_52 = arith.constant 0 : index
    %c20_53 = arith.constant 20 : index
    %93 = vector.load %arg9[%c0_52, %c20_53] : memref<16x32xf32, #tpu.memory_space<vmem>>, vector<16x4xf32>
    %cst_54 = arith.constant dense<0.000000e+00> : vector<8x16xf32>
    %94 = tpu.matmul %91, %92, %cst_54 {dimension_numbers = #tpu.dot_dimension_numbers<[1], [0], [0], [1], [0, 0, 1, 1], [], []>} : vector<8x4xf32>, vector<4x16xf32>, vector<8x16xf32> -> vector<8x16xf32>
    %cst_55 = arith.constant dense<0xFF800000> : vector<8xf32>
    %95 = vector.multi_reduction <maximumf>, %94, %cst_55 [1] : vector<8x16xf32> to vector<8xf32>
    %96 = vector.shape_cast %95 : vector<8xf32> to vector<8x1xf32>
    %97 = vector.broadcast %96 : vector<8x1xf32> to vector<8x16xf32>
    %98 = arith.subf %94, %97 : vector<8x16xf32>
    %99 = math.exp %98 : vector<8x16xf32>
    %cst_56 = arith.constant dense<0.000000e+00> : vector<8xf32>
    %100 = vector.multi_reduction <add>, %99, %cst_56 [1] : vector<8x16xf32> to vector<8xf32>
    %101 = vector.shape_cast %100 : vector<8xf32> to vector<8x1xf32>
    %cst_57 = arith.constant dense<0.000000e+00> : vector<8x4xf32>
    %102 = tpu.matmul %99, %93, %cst_57 {dimension_numbers = #tpu.dot_dimension_numbers<[1], [0], [0], [1], [0, 0, 1, 1], [], []>} : vector<8x16xf32>, vector<16x4xf32>, vector<8x4xf32> -> vector<8x4xf32>
    %103 = tpu.reciprocal %101 {approx = true} : vector<8x1xf32> -> vector<8x1xf32>
    %104 = vector.broadcast %103 : vector<8x1xf32> to vector<8x4xf32>
    %105 = arith.mulf %102, %104 : vector<8x4xf32>
    %c0_58 = arith.constant 0 : index
    %c20_59 = arith.constant 20 : index
    %106 = vector.load %arg10[%c0_58, %c20_59] : memref<8x32xf32, #tpu.memory_space<vmem>>, vector<8x4xf32>
    tpu.vector_store %arg10[%c0_58, %c20_59], %105 {strides = array<i32>} : memref<8x32xf32, #tpu.memory_space<vmem>>, vector<8x4xf32>,
    %107 = arith.index_cast %4 : i32 to index
    %c24 = arith.constant 24 : index
    %108 = vector.load %arg7[%107, %c24] : memref<16x32xf32, #tpu.memory_space<vmem>>, vector<8x4xf32>
    %c24_60 = arith.constant 24 : index
    %c0_61 = arith.constant 0 : index
    %109 = vector.load %arg8[%c24_60, %c0_61] : memref<32x16xf32, #tpu.memory_space<vmem>>, vector<4x16xf32>
    %c0_62 = arith.constant 0 : index
    %c24_63 = arith.constant 24 : index
    %110 = vector.load %arg9[%c0_62, %c24_63] : memref<16x32xf32, #tpu.memory_space<vmem>>, vector<16x4xf32>
    %cst_64 = arith.constant dense<0.000000e+00> : vector<8x16xf32>
    %111 = tpu.matmul %108, %109, %cst_64 {dimension_numbers = #tpu.dot_dimension_numbers<[1], [0], [0], [1], [0, 0, 1, 1], [], []>} : vector<8x4xf32>, vector<4x16xf32>, vector<8x16xf32> -> vector<8x16xf32>
    %cst_65 = arith.constant dense<0xFF800000> : vector<8xf32>
    %112 = vector.multi_reduction <maximumf>, %111, %cst_65 [1] : vector<8x16xf32> to vector<8xf32>
    %113 = vector.shape_cast %112 : vector<8xf32> to vector<8x1xf32>
    %114 = vector.broadcast %113 : vector<8x1xf32> to vector<8x16xf32>
    %115 = arith.subf %111, %114 : vector<8x16xf32>
    %116 = math.exp %115 : vector<8x16xf32>
    %cst_66 = arith.constant dense<0.000000e+00> : vector<8xf32>
    %117 = vector.multi_reduction <add>, %116, %cst_66 [1] : vector<8x16xf32> to vector<8xf32>
    %118 = vector.shape_cast %117 : vector<8xf32> to vector<8x1xf32>
    %cst_67 = arith.constant dense<0.000000e+00> : vector<8x4xf32>
    %119 = tpu.matmul %116, %110, %cst_67 {dimension_numbers = #tpu.dot_dimension_numbers<[1], [0], [0], [1], [0, 0, 1, 1], [], []>} : vector<8x16xf32>, vector<16x4xf32>, vector<8x4xf32> -> vector<8x4xf32>
    %120 = tpu.reciprocal %118 {approx = true} : vector<8x1xf32> -> vector<8x1xf32>
    %121 = vector.broadcast %120 : vector<8x1xf32> to vector<8x4xf32>
    %122 = arith.mulf %119, %121 : vector<8x4xf32>
    %c0_68 = arith.constant 0 : index
    %c24_69 = arith.constant 24 : index
    %123 = vector.load %arg10[%c0_68, %c24_69] : memref<8x32xf32, #tpu.memory_space<vmem>>, vector<8x4xf32>
    tpu.vector_store %arg10[%c0_68, %c24_69], %122 {strides = array<i32>} : memref<8x32xf32, #tpu.memory_space<vmem>>, vector<8x4xf32>,
    %124 = arith.index_cast %4 : i32 to index
    %c28 = arith.constant 28 : index
    %125 = vector.load %arg7[%124, %c28] : memref<16x32xf32, #tpu.memory_space<vmem>>, vector<8x4xf32>
    %c28_70 = arith.constant 28 : index
    %c0_71 = arith.constant 0 : index
    %126 = vector.load %arg8[%c28_70, %c0_71] : memref<32x16xf32, #tpu.memory_space<vmem>>, vector<4x16xf32>
    %c0_72 = arith.constant 0 : index
    %c28_73 = arith.constant 28 : index
    %127 = vector.load %arg9[%c0_72, %c28_73] : memref<16x32xf32, #tpu.memory_space<vmem>>, vector<16x4xf32>
    %cst_74 = arith.constant dense<0.000000e+00> : vector<8x16xf32>
    %128 = tpu.matmul %125, %126, %cst_74 {dimension_numbers = #tpu.dot_dimension_numbers<[1], [0], [0], [1], [0, 0, 1, 1], [], []>} : vector<8x4xf32>, vector<4x16xf32>, vector<8x16xf32> -> vector<8x16xf32>
    %cst_75 = arith.constant dense<0xFF800000> : vector<8xf32>
    %129 = vector.multi_reduction <maximumf>, %128, %cst_75 [1] : vector<8x16xf32> to vector<8xf32>
    %130 = vector.shape_cast %129 : vector<8xf32> to vector<8x1xf32>
    %131 = vector.broadcast %130 : vector<8x1xf32> to vector<8x16xf32>
    %132 = arith.subf %128, %131 : vector<8x16xf32>
    %133 = math.exp %132 : vector<8x16xf32>
    %cst_76 = arith.constant dense<0.000000e+00> : vector<8xf32>
    %134 = vector.multi_reduction <add>, %133, %cst_76 [1] : vector<8x16xf32> to vector<8xf32>
    %135 = vector.shape_cast %134 : vector<8xf32> to vector<8x1xf32>
    %cst_77 = arith.constant dense<0.000000e+00> : vector<8x4xf32>
    %136 = tpu.matmul %133, %127, %cst_77 {dimension_numbers = #tpu.dot_dimension_numbers<[1], [0], [0], [1], [0, 0, 1, 1], [], []>} : vector<8x16xf32>, vector<16x4xf32>, vector<8x4xf32> -> vector<8x4xf32>
    %137 = tpu.reciprocal %135 {approx = true} : vector<8x1xf32> -> vector<8x1xf32>
    %138 = vector.broadcast %137 : vector<8x1xf32> to vector<8x4xf32>
    %139 = arith.mulf %136, %138 : vector<8x4xf32>
    %c0_78 = arith.constant 0 : index
    %c28_79 = arith.constant 28 : index
    %140 = vector.load %arg10[%c0_78, %c28_79] : memref<8x32xf32, #tpu.memory_space<vmem>>, vector<8x4xf32>
    tpu.vector_store %arg10[%c0_78, %c28_79], %139 {strides = array<i32>} : memref<8x32xf32, #tpu.memory_space<vmem>>, vector<8x4xf32>,
    %c0_80 = arith.constant 0 : index
    %c0_81 = arith.constant 0 : index
    %141 = vector.load %arg10[%c0_80, %c0_81] : memref<8x32xf32, #tpu.memory_space<vmem>>, vector<8x32xf32>
    %c0_82 = arith.constant 0 : index
    %c0_83 = arith.constant 0 : index
    %142 = vector.load %arg4[%c0_82, %c0_83] : memref<32x32xf32, #tpu.memory_space<vmem>>, vector<32x32xf32>
    %cst_84 = arith.constant dense<0.000000e+00> : vector<8x32xf32>
    %143 = tpu.matmul %141, %142, %cst_84 {dimension_numbers = #tpu.dot_dimension_numbers<[1], [0], [0], [1], [0, 0, 1, 1], [], []>} : vector<8x32xf32>, vector<32x32xf32>, vector<8x32xf32> -> vector<8x32xf32>
    %c0_85 = arith.constant 0 : index
    %c0_86 = arith.constant 0 : index
    %144 = vector.load %arg5[%c0_85, %c0_86] : memref<1x32xf32, #tpu.memory_space<vmem>>, vector<1x32xf32>
    %145 = vector.broadcast %144 : vector<1x32xf32> to vector<8x32xf32>
    %146 = arith.addf %143, %145 : vector<8x32xf32>
    %c0_87 = arith.constant 0 : index
    %c0_88 = arith.constant 0 : index
    %c0_89 = arith.constant 0 : index
    %147 = vector.load %arg6[%c0_87, %c0_88, %c0_89] : memref<1x8x32xf32, #tpu.memory_space<vmem>>, vector<1x8x32xf32>
    %148 = vector.shape_cast %147 : vector<1x8x32xf32> to vector<8x32xf32>
    %149 = vector.shape_cast %146 : vector<8x32xf32> to vector<1x8x32xf32>
    tpu.vector_store %arg6[%c0_87, %c0_88, %c0_89], %149 {strides = array<i32>} : memref<1x8x32xf32, #tpu.memory_space<vmem>>, vector<1x8x32xf32>,
    return
  }
  func.func @transform_0(%arg0: i32, %arg1: i32) -> (i32, i32, i32) {
    %c0_i32 = arith.constant 0 : i32
    %c0_i32_0 = arith.constant 0 : i32
    %c0_i32_1 = arith.constant 0 : i32
    return %arg0, %c0_i32, %c0_i32_0 : i32, i32, i32
  }
  func.func @transform_1(%arg0: i32, %arg1: i32) -> (i32, i32) {
    %c0_i32 = arith.constant 0 : i32
    %c0_i32_0 = arith.constant 0 : i32
    %c0_i32_1 = arith.constant 0 : i32
    return %c0_i32, %c0_i32_0 : i32, i32
  }
  func.func @transform_2(%arg0: i32, %arg1: i32) -> (i32, i32) {
    %c0_i32 = arith.constant 0 : i32
    %c0_i32_0 = arith.constant 0 : i32
    %c0_i32_1 = arith.constant 0 : i32
    return %c0_i32, %c0_i32_0 : i32, i32
  }
  func.func @transform_3(%arg0: i32, %arg1: i32) -> (i32, i32) {
    %c0_i32 = arith.constant 0 : i32
    %c0_i32_0 = arith.constant 0 : i32
    %c0_i32_1 = arith.constant 0 : i32
    return %c0_i32, %c0_i32_0 : i32, i32
  }
  func.func @transform_4(%arg0: i32, %arg1: i32) -> (i32, i32, i32) {
    %c0_i32 = arith.constant 0 : i32
    %c0_i32_0 = arith.constant 0 : i32
    return %arg0, %arg1, %c0_i32 : i32, i32, i32
  }
}

</mosaic_0001>

<bundles_post_ra>
// kernel: tpu_custom_call.1
= control target key start
LH: loop header
LB: loop body
LE: loop exit
PB: predicated region body
PF: predicated region fallthrough
CT: control target
= control target key end

     0   :  { %s3112_s0 = inlined_call_operand.hbm [shape: f32[2,16,32], index: 0, kind: input, shape index: {}]   ;;  %s3113_s1 = inlined_call_operand.hbm [shape: f32[32,96], index: 1, kind: input, shape index: {}]   ;;  %s3114_s2 = inlined_call_operand.hbm [shape: f32[32,32], index: 2, kind: input, shape index: {}]   ;;  %s3115_s3 = inlined_call_operand.vmem [shape: f32[1,32], index: 3, kind: input, shape index: {}]   ;;  %s3116_s4 = inlined_call_operand.hbm [shape: f32[2,16,32], index: 4, kind: output, shape index: {}]  }
   0x1   :  { %3124 = sst [smem:[#allocation20_spill]] %s3113_s1 }
   0x2   :  { %3125 = sst [smem:[#allocation21_spill]] %s3114_s2 }
   0x3   :  { %3126 = sst [smem:[#allocation22_spill]] %s3115_s3 }
   0x4   :  { %3127 = sst [smem:[#allocation23_spill]] %s3116_s4 }
   0x5   :  { %9 = vsyncpa [#allocation7], 0 }
   0x6   :  { %11 = vsyncpa [#allocation7 + $0x1], 0 }
   0x7   :  { %12 = vsyncpa [#allocation10], 0 }
   0x8   :  { %13 = vsyncpa [#allocation8], 0 }
   0x9   :  { %15 = vsyncpa [#allocation8 + $0x1], 0  ;;  %s2693_s15 = smov 0   ;;  %s2695_s16 = smov 0  }
   0xa   :  { %s2697_s17 = smov 0   ;;  %s2699_s18 = smov 0  }
   0xb   :  { %s2701_s19 = smov 0   ;;  %s2703_s20 = smov 0  }
   0xc   :  { %s2705_s21 = smov 0   ;;  %s2707_s22 = smov 0  }
   0xd   :  { %s2709_s23 = smov 0   ;;  %s2711_s24 = smov 0  }
   0xe   :  { %s2713_s25 = smov 0  }
   0xf LB: > { %3128 = sst [smem:[#allocation16_spill]] %s2602_s15  ;;  %s2043_s26 = sadd.s32 4294967295, %s2642_s25   ;;  %s2642_s25 = sphi %s2713_s25, %s21_s25   ;;  %s2638_s24 = sphi %s2711_s24, %s3160_s24   ;;  %s2634_s23 = sphi %s2709_s23, %s3159_s23   ;;  %s2630_s22 = sphi %s2707_s22, %s3158_s22   ;;  %s2626_s21 = sphi %s2705_s21, %s3150_s21   ;;  %s2622_s20 = sphi %s2703_s20, %s3157_s20   ;;  %s2618_s19 = sphi %s2701_s19, %s3156_s19   ;;  %s2614_s18 = sphi %s2699_s18, %s3155_s18   ;;  %s2610_s17 = sphi %s2697_s17, %s3154_s17   ;;  %s2606_s16 = sphi %s2695_s16, %s3153_s16   ;;  %s2602_s15 = sphi %s2693_s15, %s3152_s15  }
  0x10   : > { %3129 = sst [smem:[#allocation17_spill]] %s2634_s23  ;;  %s2044_s27 = sadd.s32 4294967294, %s2642_s25  }
  0x11   : > { %p53_p0 = scmp.ne.s32.totalorder %s2618_s19, %s2614_s18  ;;  %p2749_p1 = scmp.eq.s32.totalorder %s2043_s26, 0 }
  0x12   : > { %p141_p2 = scmp.ne.s32.totalorder %s2610_s17, %s2606_s16  ;;  %p142_p4 = scmp.eq.s32.totalorder %s2043_s26, 3 }
  0x13   : > { %p2758_p3 = por %p2749_p1, %p53_p0  ;;  %p147_p5 = scmp.ne.s32.totalorder %s2606_s16, %s2602_s15 }
  0x14   : > { %p148_p6 = scmp.eq.s32.totalorder %s2044_s27, 3  ;;  %p2764_p7 = por %p142_p4, %p141_p2 }
  0x15   : > { %p2045_p8 = scmp.ge.s32.totalorder %s2642_s25, 1  ;;  %p155_p10 = scmp.lt.s32.totalorder %s2642_s25, 5 }
  0x16   : > { %p2769_p9 = por %p148_p6, %p147_p5  ;;  %s2644_s8 = smov [#allocation9]  }
  0x17   : > { %p2774_p11 = pnand %p2045_p8, %p155_p10  ;;  %s167_s9 = sshll.u32 %s2644_s8, 4  ;;  %s168_s9 = int_to_ptr.vmem [resolvable:$true] %s167_s9 }
  0x18   : > { %s3133_s6 = scalar_select %p2769_p9, 1, 0 }
  0x19   : > { %p2274_p12 = pneg %p2774_p11  ;;  %s2645_s11 = smov [#allocation11]  }
  0x1a   : > { %3134 = sst [smem:[#allocation18_spill]] %s3133_s6  ;;  %s180_s12 = sshll.u32 %s2645_s11, 4  ;;  %s181_s12 = int_to_ptr.vmem [resolvable:$true] %s180_s12 }
  0x1b   : > { %p2782_p13 = pnand %p2274_p12, %p2749_p1  ;;  %s2449_s13 = scalar_lea.vmem %s168_s9, 512 }
  0x1c   : > { %p2450_p2 = scmp.ne.s32.totalorder %s168_s9, %s2449_s13  ;;  %p2457_p6 = scmp.lt.s32.totalorder %s168_s9, %s168_s9 }
  0x1d   : > { %p2440_p0 = pneg %p2782_p13  ;;  %p2458_p8 = scmp.lt.s32.totalorder %s2449_s13, %s2449_s13 }
  0x1f   : > { %p2452_p4 = pnand %p2450_p2, %p2440_p0  ;;  %p2459_p10 = por %p2458_p8, %p2457_p6 }
  0x21   : > { %p2453_p5 = pneg %p2452_p4 }
  0x23   : > { %p2460_p12 = pnand %p2459_p10, %p2453_p5 }
  0x25   : > { %2463 = shalt.err (!%p2460_p12)
}
  0x26   : > { %s3117_s14 = smov 128   ;;  %s3118_s18 = smov 8  }
  0x27   : > { %s3137_s1 = sld [smem:[#allocation20_spill]]  ;;  %s2475_s8 = scalar_lea.vmem %s181_s12, 512 }
  0x28   : > { %p2476_p2 = scmp.ne.s32.totalorder %s181_s12, %s2475_s8  ;;  %p2483_p5 = scmp.lt.s32.totalorder %s181_s12, %s181_s12 }
  0x29   : > { %p2484_p8 = scmp.lt.s32.totalorder %s2475_s8, %s2475_s8 }
  0x2a   : > { %p2478_p4 = pnand %p2476_p2, %p2440_p0 }
  0x2b   : > { %p2485_p10 = por %p2484_p8, %p2483_p5 }
  0x2c   : > { %p2479_p6 = pneg %p2478_p4 }
  0x2d   : > { %2277 = dma.hbm_to_vmem [thread:$0]  (!%p2782_p13), %s3137_s1, 512, %s168_s9, [#allocation10], %s3117_s14, %s3117_s14, %s3118_s18  }
  0x2e   : > { %p2486_p12 = pnand %p2485_p10, %p2479_p6 }
  0x30   : > { %2489 = shalt.err (!%p2486_p12)
}
  0x31   : > { %s3138_s2 = sld [smem:[#allocation21_spill]]  ;;  %s30_s9 = sadd.s32 1, %s2634_s23 }
  0x32   : > { %s33_s10 = sadd.s32 1, %s2638_s24  ;;  %p31_p0 = scmp.ge.s32.totalorder %s30_s9, 2 }
  0x33   : > { %s40_s26 = sadd.s32 1, %s2622_s20  ;;  %p47_p2 = scmp.ne.s32.totalorder %s2622_s20, %s2618_s19 }
  0x34   : > { %p48_p4 = scmp.eq.s32.totalorder %s2642_s25, 0  ;;  %s3162_s9 = smov (%p31_p0, %s30_s9), 0 }
  0x35   : > { %3139 = sst [smem:[#allocation19_spill]] %s3162_s9  ;;  %s3164_s10 = smov (!%p31_p0, %s33_s10), %s2638_s24 }
  0x36   : > { %p2819_p6 = por %p48_p4, %p47_p2  ;;  %s127_s8 = ssub.s32 %s2634_s23, %s3162_s9 }
  0x37   : > { %2280 = dma.hbm_to_vmem [thread:$0]  (!%p2782_p13), %s3138_s2, 512, %s181_s12, [#allocation10], %s3117_s14, %s3117_s14, %s3118_s18  }
  0x38   : > { %p35_p13 = scmp.ge.s32.totalorder %s3164_s10, 2  ;;  %p2291_p5 = scmp.lt.s32.totalorder %s2642_s25, 4 }
  0x39   : > { %s197_s12 = sand.u32 1, %s2622_s20   ;;  %s2092_s11 = sshll.u32 %s2638_s24, 8 }
  0x3a   : > { %s3166_s10 = smov (%p35_p13, %s3164_s10), 0  ;;  %s2049_s13 = sshll.u32 %s197_s12, 4 }
  0x3b   : > { %s37_s14 = ssub.s32 %s2638_s24, %s3166_s10  ;;  %s207_s2 = scalar_lea.hbm %s3112_s0, %s2092_s11 }
  0x3c   : > { %p38_p8 = scmp.eq.s32.totalorder %s37_s14, 0  ;;  %s128_s18 = sor.u32 %s127_s8, %s37_s14 }
  0x3d   : > { %p129_p10 = scmp.eq.s32.totalorder %s128_s18, 0  ;;  %s3141_s9 = sadd.s32 1, %s2610_s17 }
  0x3e   : > { %s2836_s6 = scalar_select %p38_p8, %s2622_s20, %s40_s26  }
  0x3f   : > { %s2841_s23 = scalar_select %p129_p10, %s2610_s17, %s3141_s9  }
  0x40   : > { %s201_s15 = scalar_lea.vmem [#allocation6], %s2049_s13  ;;  %p2847_p12 = pnand %p2291_p5, %p2819_p6 }
  0x41   : > { %s208_s4 = sshll.u32 %s201_s15, 4  ;;  %s198_s14 = scalar_lea.sflag [#allocation7], %s197_s12  ;;  %s209_s4 = int_to_ptr.vmem [resolvable:$true] %s208_s4 }
  0x42   : > { %p2492_p0 = pneg %p2847_p12  ;;  %s2503_s1 = scalar_lea.vmem %s209_s4, 256 }
  0x43   : > { %p2504_p2 = scmp.ne.s32.totalorder %s209_s4, %s2503_s1  ;;  %s2648_s29 = smov [#allocation6]  }
  0x44   : > { %s2508_s18 = sshll.u32 %s2648_s29, 4  ;;  %s2509_s18 = int_to_ptr.vmem [resolvable:$false] %s2508_s18 }
  0x45   : > { %p2506_p4 = pnand %p2504_p2, %p2492_p0  ;;  %s2510_s9 = scalar_lea.vmem %s2509_s18, 512 }
  0x46   : > { %p2511_p8 = scmp.lt.s32.totalorder %s209_s4, %s2509_s18  ;;  %p2512_p10 = scmp.lt.s32.totalorder %s2510_s9, %s2503_s1 }
  0x47   : > { %p2507_p13 = pneg %p2506_p4 }
  0x48   : > { %p2513_p9 = por %p2512_p10, %p2511_p8 }
  0x4a   : > { %p2514_p6 = pnand %p2513_p9, %p2507_p13 }
  0x4c   : > { %2517 = shalt.err (!%p2514_p6)
}
  0x4d   : > { %s3143_s15 = smov 8   ;;  %s3144_s26 = smov 128  }
  0x4e   : > { %2284 = dma.hbm_to_vmem [thread:$0]  (!%p2847_p12), %s207_s2, 256, %s209_s4, %s198_s14, %s3144_s26, %s3144_s26, %s3143_s15  }
  0x4f   : > { %220 = sbr.rel (%p2774_p11) target bundleno = 1614 (0x64e), region = 36  ;;  %s222_s27 = sand.u32 (!%p2774_p11), 1, %s2618_s19  }
  0x50   : > { %s2053_s8 = sshll.u32 (!%p2774_p11), %s222_s27, 4  ;;  %s223_s12 = scalar_lea.sflag (!%p2774_p11), [#allocation7], %s222_s27 }
  0x51   : > { %s226_s11 = scalar_lea.vmem (!%p2774_p11), [#allocation6], %s2053_s8 }
  0x54   : > { %2589 = dma.done.wait (%p2758_p3), %s223_s12, 256  }
  0x55   : > { %2591 = vsyncadd (%p2758_p3), %s223_s12, 4294967040 }
  0x56   : > { %2593 = dma.done.wait (%p2749_p1), [#allocation10], 1024  }
  0x57   : > { %2595 = vsyncadd (%p2749_p1), [#allocation10], 4294966272  ;;  %s256_s2 = sand.u32 1, %s2606_s16   ;;  %p2057_p9 = scmp.ne.s32.totalorder %s2626_s21, 0 }
  0x58   : > { %s2872_s3 = sshll.u32 %s256_s2, 3  ;;  %s2649_s28 = smov (!%p2057_p9), 64  }
  0x59   : > { %s258_s4 = scalar_lea.vmem [#allocation12], %s2872_s3  ;;  %262 = sbr.rel (%p2057_p9) target bundleno = 551 (0x227), region = 52 }
  0x5a   : > { %s2650_s30 = smov (!%p2057_p9), 96  }
  0x5e   : > { %v268_v0 = vld [vmem:[#allocation9 + $0x18] sm:$0xff]  ;;  %v267_v1 = vld [vmem:[#allocation9 + $0x10] sm:$0xff]  ;;  %vm269_vm0 = vcmask 261120   ;;  %v266_v3 = vld [vmem:[#allocation9 + $0x8] sm:$0xff]  ;;  %vm401_vm1 = vcmask 130048  }
  0x5f   : > { %2144 = vmatprep.subr.mxu0 %v268_v0  ;;  %v263_v2 = vld [vmem:[%s226_s11] sm:$0xff]  ;;  %v264_v5 = vld [vmem:[%s226_s11 + $0x8] sm:$0xff] }
  0x60   : > { %2145 = vmatpush3.msra.mxu0 %v268_v0  ;;  %2152 = vmatprep.mubr.msk.f32.mxu0 %vm269_vm0, %v263_v2  ;;  %v265_v4 = vld [vmem:[#allocation9] sm:$0xff] }
  0x61   : > { %2146 = vmatprep.subr.mxu0 %v267_v1 }
  0x62   : > { %2147 = vmatpush3.msra.mxu0 %v267_v1 }
  0x63   : > { %2148 = vmatprep.subr.mxu0 %v266_v3 }
  0x64   : > { %2149 = vmatpush3.msra.mxu0 %v266_v3 }
  0x65   : > { %2150 = vmatprep.subr.mxu0 %v265_v4 }
  0x66   : > { %2151 = vmatpush3.msra.mxu0 %v265_v4 }
  0x67   : > { %2153 = vmatmul.mubr.msk.f32.vlgmr.msra.gmra.mxu0 %vm269_vm0, %v264_v5 }
 0x127   : > { %v2154_v6 = vpop.f32.mrf.mxu0 }
 0x128   : > { %352 = vst.msk [vmem:[#allocation2 + $0x8] sm:$0xff] %vm269_vm0, %v2154_v6 }
 0x129   : > { %v342_v7 = vpop.f32.mrf.mxu0 }
 0x12a   : > { %351 = vst.msk [vmem:[#allocation2] sm:$0xff] %vm269_vm0, %v342_v7  ;;  %355 = vrot.lane.b32.xlu1 %v342_v7, %s2649_s28  ;;  %363 = vrot.lane.b32.xlu0 %v342_v7, %s2650_s30 }
 0x12e   : > { %357 = vrot.lane.b32.xlu1 %v2154_v6, %s2649_s28  ;;  %365 = vrot.lane.b32.xlu0 %v2154_v6, %s2650_s30 }
 0x19c   : > { %v356_v8 = vpop.permute.xlu1 %355  ;;  %v364_v9 = vpop.permute.xlu0 %363 }
 0x19d   : > { %361 = vst.msk [vmem:[#allocation4] sm:$0xff] %vm269_vm0, %v356_v8  ;;  %369 = vxpose.xlu0.b32.start [1/2] (short) (narrow) %v364_v9, 32 }
 0x1a0   : > { %v358_v10 = vpop.permute.xlu1 %357  ;;  %v366_v11 = vpop.permute.xlu0 %365 }
 0x1a1   : > { %362 = vst.msk [vmem:[#allocation4 + $0x8] sm:$0xff] %vm269_vm0, %v358_v10  ;;  %370 = vxpose.xlu0.b32.end [2/2] (short) (narrow) %v366_v11, 32 }
 0x219   : > { %v385_v12 = vpop.trf.xlu0 }
 0x21a   : > { %402 = vst.msk [vmem:[#allocation3] sm:$0xff] %vm401_vm1, %v385_v12 }
 0x21d   : > { %v386_v13 = vpop.trf.xlu0 }
 0x21e   : > { %403 = vst.msk [vmem:[#allocation3 + $0x8] sm:$0xff] %vm401_vm1, %v386_v13 }
 0x221   : > { %v387_v14 = vpop.trf.xlu0 }
 0x222   : > { %404 = vst.msk [vmem:[#allocation3 + $0x10] sm:$0xff] %vm401_vm1, %v387_v14 }
 0x225   : > { %v388_v15 = vpop.trf.xlu0 }
 0x226   : > { %405 = vst.msk [vmem:[#allocation3 + $0x18] sm:$0xff] %vm401_vm1, %v388_v15 }
 0x227 PF: > { %v409_v16 = vld [vmem:[#allocation3] sm:$0xf]  ;;  %vm416_vm2 = vcmask 1043456   ;;  %s2060_s7 = sshll.u32 %s2626_s21, 3  ;;  %v2651_v17 = vmov 0.0   ;;  %vm2652_vm3 = vmmov 0  }
 0x228   : > { %2155 = vmatprep.subr.mxu1 %v2651_v17  ;;  %2157 = vmatprep.mubr.msk.f32.mxu1 %vm2652_vm3, %v2651_v17  ;;  %vm412_vm4 = vcmask 31744   ;;  %v577_v18 = vld [vmem:[#allocation3 + $0x4] sm:$0xf]  ;;  %s407_s13 = scalar_lea.vmem [#allocation2], %s2060_s7  ;;  %s2653_s14 = smov 124   ;;  %v2893_v20 = vld [vmem:[#allocation4 + $0x8] sm:$0xff] }
 0x229   : > { %2156 = vmatpush3.msk.msra.mxu1 %vm416_vm2, %v409_v16  ;;  %v576_v19 = vld [vmem:[%s407_s13] sm:$0xff]  ;;  %2167 = vmatprep.subr.mxu0 %v2651_v17  ;;  %s2654_s1 = smov 116   ;;  %s2655_s29 = smov 120   ;;  %v2899_v21 = vld [vmem:[#allocation4] sm:$0xff]  ;;  %v757_v22 = vld [vmem:[#allocation3 + $0x8] sm:$0xf] }
 0x22a   : > { %581 = vrot.lane.b32.xlu0 %v576_v19, %s2653_s14  ;;  %2158 = vmatmul.mubr.msk.f32.vlgmr.msra.gmra.mxu1 %vm412_vm4, %v576_v19  ;;  %s2656_s18 = smov 112   ;;  %s2657_s9 = smov 108   ;;  %v937_v24 = vld [vmem:[#allocation3 + $0xc] sm:$0xf]  ;;  %v1117_v27 = vld [vmem:[#allocation3 + $0x10] sm:$0xf] }
 0x22b   : > { %941 = vrot.lane.b32.xlu1 %v576_v19, %s2654_s1  ;;  %2168 = vmatpush3.msk.msra.mxu0 %vm416_vm2, %v577_v18  ;;  %s2658_s15 = smov 104   ;;  %s2659_s26 = smov 100   ;;  %v1297_v29 = vld [vmem:[#allocation3 + $0x14] sm:$0xf]  ;;  %vm490_vm5 = vcmask 130048   ;;  %vm754_vm6 = vcmask 64544  }
 0x22c   : > { %2169 = vmatprep.mubr.msk.f32.mxu0 %vm2652_vm3, %v2651_v17  ;;  %2179 = vmatprep.subr.mxu0 %v2651_v17  ;;  %s2660_s27 = smov 4   ;;  %s2661_s8 = smov 8   ;;  %vm934_vm7 = vcmask 97344   ;;  %vm1114_vm8 = vcmask 130144   ;;  %vm1294_vm9 = vcmask 162944   ;;  %vm1474_vm10 = vcmask 195744  }
 0x22d   : > { %2160 = vmatprep.subr.mxu1 %v2651_v17  ;;  %2164 = vmatprep.mubr.msk.f32.mxu1 %vm2652_vm3, %v2651_v17  ;;  %v1477_v31 = vld [vmem:[#allocation3 + $0x18] sm:$0xf]  ;;  %v1657_v33 = vld [vmem:[#allocation3 + $0x1c] sm:$0xf]  ;;  %s2662_s12 = smov 12   ;;  %s2663_s11 = smov 16  }
 0x22e   : > { %761 = vrot.lane.b32.xlu0 %v576_v19, %s2655_s29  ;;  %2161 = vmatpush3.msra.mxu1 %v2893_v20  ;;  %s2664_s28 = smov 20   ;;  %s2665_s30 = smov 24   ;;  %vm1654_vm11 = vcmask 228544   ;;  %vm1834_vm12 = vcmask 261344   ;;  %vm1848_vm13 = vcmask 261120  }
 0x22f   : > { %1121 = vrot.lane.b32.xlu1 %v576_v19, %s2656_s18  ;;  %2162 = vmatprep.subr.mxu1 %v2651_v17  ;;  %s2666_s7 = smov 28   ;;  %s2088_s13 = sshll.u32 %s2630_s22, 1 }
 0x230   : > { %2163 = vmatpush3.msra.mxu1 %v2899_v21 }
 0x231   : > { %2172 = vmatprep.subr.mxu1 %v2651_v17 }
 0x232   : > { %1301 = vrot.lane.b32.xlu0 %v576_v19, %s2657_s9 }
 0x233   : > { %1481 = vrot.lane.b32.xlu1 %v576_v19, %s2658_s15 }
 0x236   : > { %1661 = vrot.lane.b32.xlu0 %v576_v19, %s2659_s26 }
 0x237   : > { %669 = vrot.lane.b32.xlu1 %v2899_v21, %s2653_s14 }
 0x23a   : > { %671 = vrot.lane.b32.xlu0 %v2893_v20, %s2653_s14  ;;  %s1935_s14 = sadd.s32 %s2626_s21, %s2088_s13  ;;  %s1924_s21 = scalar_lea.sflag [#allocation8], %s256_s2 }
 0x23b   : > { %851 = vrot.lane.b32.xlu1 %v2893_v20, %s2655_s29 }
 0x23e   : > { %849 = vrot.lane.b32.xlu0 %v2899_v21, %s2655_s29 }
 0x23f   : > { %1031 = vrot.lane.b32.xlu1 %v2893_v20, %s2654_s1 }
 0x242   : > { %1029 = vrot.lane.b32.xlu0 %v2899_v21, %s2654_s1 }
 0x243   : > { %1211 = vrot.lane.b32.xlu1 %v2893_v20, %s2656_s18 }
 0x246   : > { %1209 = vrot.lane.b32.xlu0 %v2899_v21, %s2656_s18  ;;  %s3145_s18 = sld [smem:[#allocation22_spill]] }
 0x247   : > { %1391 = vrot.lane.b32.xlu1 %v2893_v20, %s2657_s9 }
 0x29c   : > { %v582_v23 = vpop.permute.xlu0 %581 }
 0x29d   : > { %2170 = vmatmul.mubr.msk.f32.vlgmr.msra.gmra.mxu0 %vm412_vm4, %v582_v23  ;;  %v942_v26 = vpop.permute.xlu1 %941 }
 0x29e   : > { %2180 = vmatpush3.msk.msra.mxu0 %vm416_vm2, %v757_v22  ;;  %2181 = vmatprep.mubr.msk.f32.mxu0 %vm2652_vm3, %v2651_v17 }
 0x29f   : > { %2191 = vmatprep.subr.mxu0 %v2651_v17 }
 0x2a0   : > { %v762_v25 = vpop.permute.xlu0 %761 }
 0x2a1   : > { %2182 = vmatmul.mubr.msk.f32.vlgmr.msra.gmra.mxu0 %vm412_vm4, %v762_v25  ;;  %v1122_v28 = vpop.permute.xlu1 %1121 }
 0x2a2   : > { %2192 = vmatpush3.msk.msra.mxu0 %vm416_vm2, %v937_v24  ;;  %2193 = vmatprep.mubr.msk.f32.mxu0 %vm2652_vm3, %v2651_v17 }
 0x2a3   : > { %2203 = vmatprep.subr.mxu0 %v2651_v17 }
 0x2a4   : > { %v1302_v30 = vpop.permute.xlu0 %1301 }
 0x2a5   : > { %2194 = vmatmul.mubr.msk.f32.vlgmr.msra.gmra.mxu0 %vm412_vm4, %v942_v26  ;;  %v1482_v32 = vpop.permute.xlu1 %1481 }
 0x2a6   : > { %2204 = vmatpush3.msk.msra.mxu0 %vm416_vm2, %v1117_v27  ;;  %2205 = vmatprep.mubr.msk.f32.mxu0 %vm2652_vm3, %v2651_v17 }
 0x2a7   : > { %2215 = vmatprep.subr.mxu0 %v2651_v17 }
 0x2a8   : > { %v1662_v34 = vpop.permute.xlu0 %1661 }
 0x2a9   : > { %2206 = vmatmul.mubr.msk.f32.vlgmr.msra.gmra.mxu0 %vm412_vm4, %v1122_v28  ;;  %v670_v38 = vpop.permute.xlu1 %669 }
 0x2aa   : > { %2216 = vmatpush3.msk.msra.mxu0 %vm416_vm2, %v1297_v29  ;;  %2217 = vmatprep.mubr.msk.f32.mxu0 %vm2652_vm3, %v2651_v17 }
 0x2ab   : > { %2227 = vmatprep.subr.mxu0 %v2651_v17 }
 0x2ac   : > { %v672_v0 = vpop.permute.xlu0 %671 }
 0x2ad   : > { %2218 = vmatmul.mubr.msk.f32.vlgmr.msra.gmra.mxu0 %vm412_vm4, %v1302_v30  ;;  %v2951_v40 = vpop.permute.xlu1 %851 }
 0x2ae   : > { %2228 = vmatpush3.msk.msra.mxu0 %vm416_vm2, %v1477_v31  ;;  %2229 = vmatprep.mubr.msk.f32.mxu0 %vm2652_vm3, %v2651_v17 }
 0x2af   : > { %2239 = vmatprep.subr.mxu0 %v2651_v17 }
 0x2b0   : > { %v850_v5 = vpop.permute.xlu0 %849 }
 0x2b1   : > { %2230 = vmatmul.mubr.msk.f32.vlgmr.msra.gmra.mxu0 %vm412_vm4, %v1482_v32  ;;  %v2955_v46 = vpop.permute.xlu1 %1031 }
 0x2b2   : > { %2240 = vmatpush3.msk.msra.mxu0 %vm416_vm2, %v1657_v33  ;;  %2241 = vmatprep.mubr.msk.f32.mxu0 %vm2652_vm3, %v2651_v17 }
 0x2b3   : > { %2251 = vmatprep.subr.mxu0 %v2651_v17 }
 0x2b4   : > { %v1030_v6 = vpop.permute.xlu0 %1029 }
 0x2b5   : > { %2242 = vmatmul.mubr.msk.f32.vlgmr.msra.gmra.mxu0 %vm412_vm4, %v1662_v34  ;;  %v2958_v51 = vpop.permute.xlu1 %1211 }
 0x2b6   : > { %2259 = vmatprep.mubr.msk.f32.mxu0 %vm2652_vm3, %v2651_v17 }
 0x2b8   : > { %v1210_v7 = vpop.permute.xlu0 %1209 }
 0x2b9   : > { %v2963_v55 = vpop.permute.xlu1 %1391 }
 0x2ea   : > { %v486_v35 = vpop.f32.mrf.mxu1 }
 0x2eb   : > { %v491_v36 = vsel %vm490_vm5, %v486_v35, -inf }
 0x2ec   : > { %492 = vmax.xlane.f32.xlu1 %v491_v36  ;;  %v2159_v37 = vpop.f32.mrf.mxu1 }
 0x35d   : > { %v654_v39 = vpop.f32.mrf.mxu0 }
 0x35e   : > { %v658_v41 = vsel %vm490_vm5, %v654_v39, -inf }
 0x35f   : > { %659 = vmax.xlane.f32.xlu0 %v658_v41  ;;  %v2171_v42 = vpop.f32.mrf.mxu0 }
 0x361   : > { %v834_v43 = vpop.f32.mrf.mxu0 }
 0x362   : > { %v838_v44 = vsel %vm490_vm5, %v834_v43, -inf }
 0x363   : > { %839 = vmax.xlane.f32.xlu0 %v838_v44  ;;  %v2183_v45 = vpop.f32.mrf.mxu0 }
 0x365   : > { %v1014_v47 = vpop.f32.mrf.mxu0 }
 0x366   : > { %v1018_v48 = vsel %vm490_vm5, %v1014_v47, -inf }
 0x367   : > { %v2195_v49 = vpop.f32.mrf.mxu0  ;;  %1019 = vmax.xlane.f32.xlu1 %v1018_v48 }
 0x369   : > { %v1194_v50 = vpop.f32.mrf.mxu0 }
 0x36a   : > { %v1198_v52 = vsel %vm490_vm5, %v1194_v50, -inf }
 0x36b   : > { %1199 = vmax.xlane.f32.xlu0 %v1198_v52  ;;  %v2207_v53 = vpop.f32.mrf.mxu0 }
 0x36d   : > { %v2961_v54 = vpop.f32.mrf.mxu0 }
 0x36e   : > { %v1378_v2 = vsel %vm490_vm5, %v2961_v54, -inf }
 0x36f   : > { %v2219_v56 = vpop.f32.mrf.mxu0 }
 0x371   : > { %v2965_v57 = vpop.f32.mrf.mxu0 }
 0x372   : > { %v1558_v3 = vsel %vm490_vm5, %v2965_v57, -inf }
 0x373   : > { %v2231_v58 = vpop.f32.mrf.mxu0 }
 0x375   : > { %v493_v59 = vpop.xlane.xlu1 %492  ;;  %v2967_v60 = vpop.f32.mrf.mxu0 }
 0x376   : > { %v494_v61 = vsub.f32 %v486_v35, %v493_v59  ;;  %v1738_v4 = vsel %vm490_vm5, %v2967_v60, -inf }
 0x377   : > { %v2243_v62 = vpop.f32.mrf.mxu0 }
 0x378   : > { %v495_v63 = vmul.f32 1.442695, %v494_v61  ;;  %1571 = vrot.lane.b32.xlu1 %v2893_v20, %s2658_s15 }
 0x37a   : > { %2406 = vpow2.f32 %v495_v63 }
 0x381   : > { %1389 = vrot.lane.b32.xlu0 %v2899_v21, %s2657_s9  ;;  %s2089_s9 = sshll.u32 %s1935_s14, 7 }
 0x387   : > { %v2973_v1 = vpop.eup %2406 }
 0x388   : > { %2165 = vmatmul.mubr.msk.f32.vlgmr.msra.gmra.mxu1 %vm490_vm5, %v2973_v1  ;;  %v497_v49 = vsel %vm490_vm5, %v2973_v1, 0.0 }
 0x389   : > { %2173 = vmatpush3.msra.mxu1 %v672_v0  ;;  %2176 = vmatprep.mubr.msk.f32.mxu1 %vm2652_vm3, %v2651_v17 }
 0x38a   : > { %2174 = vmatprep.subr.mxu1 %v2651_v17 }
 0x38b   : > { %2175 = vmatpush3.msra.mxu1 %v670_v38 }
 0x38c   : > { %2184 = vmatprep.subr.mxu1 %v2651_v17 }
 0x39c   : > { %1379 = vmax.xlane.f32.xlu1 %v1378_v2 }
 0x3a0   : > { %1559 = vmax.xlane.f32.xlu0 %v1558_v3  ;;  %1739 = vmax.xlane.f32.xlu1 %v1738_v4 }
 0x3b1   : > { %1751 = vrot.lane.b32.xlu1 %v2893_v20, %s2659_s26 }
 0x3b6   : > { %1569 = vrot.lane.b32.xlu0 %v2899_v21, %s2658_s15  ;;  %s1939_s15 = sshll.u32 %s258_s4, 4  ;;  %s1940_s15 = int_to_ptr.vmem [resolvable:$true] %s1939_s15 }
 0x3b7   : > { %s2518_s22 = scalar_lea.vmem %s1940_s15, 128 }
 0x3b8   : > { %p2519_p1 = scmp.ne.s32.totalorder %s1940_s15, %s2518_s22 }
 0x3ba   : > { %1749 = vrot.lane.b32.xlu0 %v2899_v21, %s2659_s26  ;;  %p2520_p3 = pnand %p2519_p1, %p2764_p7 }
 0x3bc   : > { %p2521_p11 = pneg %p2520_p3 }
 0x3e8   : > { %v660_v8 = vpop.xlane.xlu0 %659 }
 0x3e9   : > { %v661_v9 = vsub.f32 %v654_v39, %v660_v8 }
 0x3eb   : > { %v662_v10 = vmul.f32 1.442695, %v661_v9 }
 0x3ec   : > { %v840_v11 = vpop.xlane.xlu0 %839 }
 0x3ed   : > { %2408 = vpow2.f32 %v662_v10  ;;  %v841_v12 = vsub.f32 %v834_v43, %v840_v11 }
 0x3ef   : > { %v842_v13 = vmul.f32 1.442695, %v841_v12 }
 0x3f0   : > { %v1020_v14 = vpop.xlane.xlu1 %1019 }
 0x3f1   : > { %2410 = vpow2.f32 %v842_v13  ;;  %v1021_v15 = vsub.f32 %v1014_v47, %v1020_v14  ;;  %v1840_v14 = vld [vmem:[#allocation11 + $0x18] sm:$0xff] }
 0x3f2   : > { %2252 = vmatpush3.msra.mxu0 %v1840_v14 }
 0x3f3   : > { %v1022_v16 = vmul.f32 1.442695, %v1021_v15  ;;  %v1839_v15 = vld [vmem:[#allocation11 + $0x10] sm:$0xff]  ;;  %2253 = vmatprep.subr.mxu0 %v2651_v17 }
 0x3f4   : > { %v1200_v18 = vpop.xlane.xlu0 %1199  ;;  %v1572_v30 = vpop.permute.xlu1 %1571  ;;  %2254 = vmatpush3.msra.mxu0 %v1839_v15 }
 0x3f5   : > { %2412 = vpow2.f32 %v1022_v16  ;;  %v1201_v19 = vsub.f32 %v1194_v50, %v1200_v18  ;;  %2255 = vmatprep.subr.mxu0 %v2651_v17 }
 0x3f7   : > { %v1202_v20 = vmul.f32 1.442695, %v1201_v19  ;;  %v1838_v19 = vld [vmem:[#allocation11 + $0x8] sm:$0xff] }
 0x3f8   : > { %v1390_v29 = vpop.permute.xlu0 %1389  ;;  %2256 = vmatpush3.msra.mxu0 %v1838_v19 }
 0x3f9   : > { %2414 = vpow2.f32 %v1202_v20  ;;  %2257 = vmatprep.subr.mxu0 %v2651_v17 }
 0x3fa   : > { %v2409_v21 = vpop.eup %2408 }
 0x3fb   : > { %2177 = vmatmul.mubr.msk.f32.vlgmr.msra.gmra.mxu1 %vm490_vm5, %v2409_v21  ;;  %v664_v22 = vsel %vm490_vm5, %v2409_v21, 0.0 }
 0x3fc   : > { %2185 = vmatpush3.msra.mxu1 %v2951_v40  ;;  %665 = vadd.xlane.f32.xlu1 %v664_v22  ;;  %v1837_v22 = vld [vmem:[#allocation11] sm:$0xff] }
 0x3fd   : > { %2186 = vmatprep.subr.mxu1 %v2651_v17  ;;  %2188 = vmatprep.mubr.msk.f32.mxu1 %vm2652_vm3, %v2651_v17 }
 0x3fe   : > { %v2411_v23 = vpop.eup %2410  ;;  %2187 = vmatpush3.msra.mxu1 %v850_v5  ;;  %2258 = vmatpush3.msra.mxu0 %v1837_v22 }
 0x3ff   : > { %2196 = vmatprep.subr.mxu1 %v2651_v17  ;;  %2189 = vmatmul.mubr.msk.f32.vlgmr.msra.gmra.mxu1 %vm490_vm5, %v2411_v23  ;;  %v844_v24 = vsel %vm490_vm5, %v2411_v23, 0.0 }
 0x400   : > { %2197 = vmatpush3.msra.mxu1 %v2955_v46  ;;  %845 = vadd.xlane.f32.xlu0 %v844_v24 }
 0x401   : > { %2198 = vmatprep.subr.mxu1 %v2651_v17  ;;  %2200 = vmatprep.mubr.msk.f32.mxu1 %vm2652_vm3, %v2651_v17 }
 0x402   : > { %v2413_v25 = vpop.eup %2412  ;;  %2199 = vmatpush3.msra.mxu1 %v1030_v6 }
 0x403   : > { %2208 = vmatprep.subr.mxu1 %v2651_v17  ;;  %2201 = vmatmul.mubr.msk.f32.vlgmr.msra.gmra.mxu1 %vm490_vm5, %v2413_v25  ;;  %v1024_v26 = vsel %vm490_vm5, %v2413_v25, 0.0 }
 0x404   : > { %2209 = vmatpush3.msra.mxu1 %v2958_v51  ;;  %1025 = vadd.xlane.f32.xlu0 %v1024_v26 }
 0x405   : > { %2210 = vmatprep.subr.mxu1 %v2651_v17  ;;  %2212 = vmatprep.mubr.msk.f32.mxu1 %vm2652_vm3, %v2651_v17 }
 0x406   : > { %v2415_v27 = vpop.eup %2414  ;;  %2211 = vmatpush3.msra.mxu1 %v1210_v7 }
 0x407   : > { %2220 = vmatprep.subr.mxu1 %v2651_v17  ;;  %2213 = vmatmul.mubr.msk.f32.vlgmr.msra.gmra.mxu1 %vm490_vm5, %v2415_v27  ;;  %v1204_v28 = vsel %vm490_vm5, %v2415_v27, 0.0 }
 0x408   : > { %2221 = vmatpush3.msra.mxu1 %v2963_v55  ;;  %1205 = vadd.xlane.f32.xlu1 %v1204_v28 }
 0x409   : > { %2222 = vmatprep.subr.mxu1 %v2651_v17  ;;  %2224 = vmatprep.mubr.msk.f32.mxu1 %vm2652_vm3, %v2651_v17 }
 0x40a   : > { %2223 = vmatpush3.msra.mxu1 %v1390_v29 }
 0x40b   : > { %2232 = vmatprep.subr.mxu1 %v2651_v17 }
 0x425   : > { %v1380_v31 = vpop.xlane.xlu1 %1379 }
 0x426   : > { %v1381_v32 = vsub.f32 %v2961_v54, %v1380_v31 }
 0x428   : > { %v1382_v33 = vmul.f32 1.442695, %v1381_v32 }
 0x429   : > { %v1560_v34 = vpop.xlane.xlu0 %1559  ;;  %v1740_v35 = vpop.xlane.xlu1 %1739 }
 0x42a   : > { %2416 = vpow2.f32 %v1382_v33  ;;  %v1561_v36 = vsub.f32 %v2965_v57, %v1560_v34  ;;  %v1741_v37 = vsub.f32 %v2967_v60, %v1740_v35 }
 0x42c   : > { %v1562_v38 = vmul.f32 1.442695, %v1561_v36  ;;  %v1742_v39 = vmul.f32 1.442695, %v1741_v37 }
 0x42d   : > { %v1570_v40 = vpop.permute.xlu0 %1569  ;;  %v1752_v43 = vpop.permute.xlu1 %1751 }
 0x42e   : > { %2418 = vpow2.f32 %v1562_v38  ;;  %v2085_v38 = vld [vmem:[%s3145_s18] ss:$0 sm:$0xff] }
 0x42f   : > { %2420 = vpow2.f32 %v1742_v39 }
 0x431   : > { %v1750_v46 = vpop.permute.xlu0 %1749 }
 0x437   : > { %v2417_v41 = vpop.eup %2416 }
 0x438   : > { %2225 = vmatmul.mubr.msk.f32.vlgmr.msra.gmra.mxu1 %vm490_vm5, %v2417_v41  ;;  %v1384_v42 = vsel %vm490_vm5, %v2417_v41, 0.0 }
 0x439   : > { %2233 = vmatpush3.msra.mxu1 %v1572_v30  ;;  %1385 = vadd.xlane.f32.xlu0 %v1384_v42 }
 0x43a   : > { %2234 = vmatprep.subr.mxu1 %v2651_v17  ;;  %2236 = vmatprep.mubr.msk.f32.mxu1 %vm2652_vm3, %v2651_v17 }
 0x43b   : > { %v2419_v44 = vpop.eup %2418  ;;  %2235 = vmatpush3.msra.mxu1 %v1570_v40 }
 0x43c   : > { %v2421_v45 = vpop.eup %2420  ;;  %2244 = vmatprep.subr.mxu1 %v2651_v17  ;;  %2237 = vmatmul.mubr.msk.f32.vlgmr.msra.gmra.mxu1 %vm490_vm5, %v2419_v44  ;;  %v1564_v47 = vsel %vm490_vm5, %v2419_v44, 0.0 }
 0x43d   : > { %2245 = vmatpush3.msra.mxu1 %v1752_v43  ;;  %1565 = vadd.xlane.f32.xlu1 %v1564_v47  ;;  %v1744_v48 = vsel %vm490_vm5, %v2421_v45, 0.0 }
 0x43e   : > { %1745 = vadd.xlane.f32.xlu0 %v1744_v48  ;;  %2246 = vmatprep.subr.mxu1 %v2651_v17 }
 0x43f   : > { %2247 = vmatpush3.msra.mxu1 %v1750_v46  ;;  %2248 = vmatprep.mubr.msk.f32.mxu1 %vm2652_vm3, %v2651_v17 }
 0x440   : > { %2249 = vmatmul.mubr.msk.f32.vlgmr.msra.gmra.mxu1 %vm490_vm5, %v2421_v45 }
 0x441   : > { %498 = vadd.xlane.f32.xlu1 %v497_v49 }
 0x448   : > { %v569_v50 = vpop.f32.mrf.mxu1 }
 0x44a   : > { %v2166_v51 = vpop.f32.mrf.mxu1 }
 0x485   : > { %v666_v52 = vpop.xlane.xlu1 %665 }
 0x486   : > { %2422 = vrcp.f32 %v666_v52 }
 0x489   : > { %v846_v53 = vpop.xlane.xlu0 %845 }
 0x48a   : > { %2424 = vrcp.f32 %v846_v53 }
 0x48d   : > { %v1026_v54 = vpop.xlane.xlu0 %1025 }
 0x48e   : > { %2426 = vrcp.f32 %v1026_v54 }
 0x491   : > { %v1206_v55 = vpop.xlane.xlu1 %1205 }
 0x492   : > { %2428 = vrcp.f32 %v1206_v55 }
 0x493   : > { %v2423_v56 = vpop.eup %2422 }
 0x497   : > { %v2425_v60 = vpop.eup %2424 }
 0x49b   : > { %v2427_v0 = vpop.eup %2426 }
 0x49f   : > { %v2429_v5 = vpop.eup %2428 }
 0x4bb   : > { %v744_v57 = vpop.f32.mrf.mxu1 }
 0x4bc   : > { %v749_v58 = vmul.f32 %v2423_v56, %v744_v57 }
 0x4bd   : > { %v2178_v59 = vpop.f32.mrf.mxu1 }
 0x4be   : > { %751 = vrot.lane.b32.xlu0 %v749_v58, %s2660_s27 }
 0x4bf   : > { %v924_v61 = vpop.f32.mrf.mxu1 }
 0x4c0   : > { %v929_v62 = vmul.f32 %v2425_v60, %v924_v61 }
 0x4c1   : > { %v2190_v63 = vpop.f32.mrf.mxu1 }
 0x4c2   : > { %931 = vrot.lane.b32.xlu1 %v929_v62, %s2661_s8  ;;  %v1386_v12 = vpop.xlane.xlu0 %1385  ;;  %s3146_s8 = sld [smem:[#allocation23_spill]] }
 0x4c3   : > { %v1104_v1 = vpop.f32.mrf.mxu1 }
 0x4c4   : > { %v1109_v2 = vmul.f32 %v2427_v0, %v1104_v1 }
 0x4c5   : > { %v2202_v3 = vpop.f32.mrf.mxu1 }
 0x4c6   : > { %v1566_v4 = vpop.xlane.xlu1 %1565  ;;  %1111 = vrot.lane.b32.xlu1 %v1109_v2, %s2662_s12 }
 0x4c7   : > { %v1284_v6 = vpop.f32.mrf.mxu1  ;;  %v1746_v13 = vpop.xlane.xlu0 %1745 }
 0x4c8   : > { %v1289_v7 = vmul.f32 %v2429_v5, %v1284_v6  ;;  %s3053_s12 = scalar_lea.hbm %s3146_s8, %s2089_s9 }
 0x4c9   : > { %v2214_v8 = vpop.f32.mrf.mxu1 }
 0x4ca   : > { %v499_v9 = vpop.xlane.xlu1 %498  ;;  %1291 = vrot.lane.b32.xlu0 %v1289_v7, %s2663_s11  ;;  %s2667_s11 = smov [#allocation12]  }
 0x4cb   : > { %2430 = vrcp.f32 %v499_v9 }
 0x4cc   : > { %2432 = vrcp.f32 %v1386_v12 }
 0x4cd   : > { %2434 = vrcp.f32 %v1566_v4 }
 0x4ce   : > { %2436 = vrcp.f32 %v1746_v13 }
 0x4d8   : > { %v2431_v10 = vpop.eup %2430 }
 0x4d9   : > { %v574_v11 = vmul.f32 %v2431_v10, %v569_v50  ;;  %v2433_v16 = vpop.eup %2432 }
 0x4da   : > { %v2435_v23 = vpop.eup %2434 }
 0x4db   : > { %575 = vst.msk [vmem:[#allocation5] sm:$0xff] %vm412_vm4, %v574_v11  ;;  %v2437_v27 = vpop.eup %2436 }
 0x4f8   : > { %v1464_v18 = vpop.f32.mrf.mxu1 }
 0x4f9   : > { %v1469_v20 = vmul.f32 %v2433_v16, %v1464_v18 }
 0x4fa   : > { %v2226_v21 = vpop.f32.mrf.mxu1 }
 0x4fb   : > { %1471 = vrot.lane.b32.xlu1 %v1469_v20, %s2664_s28  ;;  %s2522_s28 = sshll.u32 %s2667_s11, 4  ;;  %s2523_s28 = int_to_ptr.vmem [resolvable:$false] %s2522_s28 }
 0x4fc   : > { %v1644_v24 = vpop.f32.mrf.mxu1  ;;  %p2525_p5 = scmp.lt.s32.totalorder %s1940_s15, %s2523_s28 }
 0x4fd   : > { %v1649_v25 = vmul.f32 %v2435_v23, %v1644_v24 }
 0x4fe   : > { %v2238_v26 = vpop.f32.mrf.mxu1 }
 0x4ff   : > { %1651 = vrot.lane.b32.xlu0 %v1649_v25, %s2665_s30  ;;  %s2524_s30 = scalar_lea.vmem %s2523_s28, 256 }
 0x500   : > { %v1824_v28 = vpop.f32.mrf.mxu1  ;;  %p2526_p12 = scmp.lt.s32.totalorder %s2524_s30, %s2518_s22 }
 0x501   : > { %v1829_v29 = vmul.f32 %v2437_v27, %v1824_v28 }
 0x502   : > { %v2250_v30 = vpop.f32.mrf.mxu1  ;;  %p2527_p0 = por %p2526_p12, %p2525_p5 }
 0x503   : > { %1831 = vrot.lane.b32.xlu1 %v1829_v29, %s2666_s7 }
 0x504   : > { %p2528_p2 = pnand %p2527_p0, %p2521_p11 }
 0x530   : > { %v752_v31 = vpop.permute.xlu0 %751 }
 0x531   : > { %755 = vst.msk [vmem:[#allocation5] sm:$0xff] %vm754_vm6, %v752_v31 }
 0x534   : > { %v932_v32 = vpop.permute.xlu1 %931 }
 0x535   : > { %935 = vst.msk [vmem:[#allocation5] sm:$0xff] %vm934_vm7, %v932_v32 }
 0x538   : > { %v1112_v33 = vpop.permute.xlu1 %1111 }
 0x539   : > { %1115 = vst.msk [vmem:[#allocation5] sm:$0xff] %vm1114_vm8, %v1112_v33 }
 0x53c   : > { %v1292_v17 = vpop.permute.xlu0 %1291 }
 0x53d   : > { %1295 = vst.msk [vmem:[#allocation5] sm:$0xff] %vm1294_vm9, %v1292_v17 }
 0x56d   : > { %v1472_v34 = vpop.permute.xlu1 %1471 }
 0x56e   : > { %1475 = vst.msk [vmem:[#allocation5] sm:$0xff] %vm1474_vm10, %v1472_v34 }
 0x571   : > { %v1652_v35 = vpop.permute.xlu0 %1651 }
 0x572   : > { %1655 = vst.msk [vmem:[#allocation5] sm:$0xff] %vm1654_vm11, %v1652_v35 }
 0x575   : > { %v1832_v36 = vpop.permute.xlu1 %1831 }
 0x576   : > { %1835 = vst.msk [vmem:[#allocation5] sm:$0xff] %vm1834_vm12, %v1832_v36 }
 0x57d   : > { %v1836_v37 = vld [vmem:[#allocation5] sm:$0xff] }
 0x57e   : > { %2260 = vmatmul.mubr.msk.f32.vlgmr.msra.gmra.mxu0 %vm1848_vm13, %v1836_v37 }
 0x63e   : > { %v1918_v39 = vpop.f32.mrf.mxu0 }
 0x63f   : > { %v1919_v40 = vadd.f32 %v2085_v38, %v1918_v39 }
 0x640   : > { %v2261_v41 = vpop.f32.mrf.mxu0 }
 0x641   : > { %1922 = vst.msk [vmem:[%s258_s4] sm:$0xff] %vm1848_vm13, %v1919_v40 }
 0x642   : > { %2531 = shalt.err (!%p2528_p2)
}
 0x643   : > { %s2532_s3 = scalar_lea.hbm %s3053_s12, 128  ;;  %s2536_s7 = scalar_lea.hbm %s3146_s8, 512 }
 0x644   : > { %p2533_p4 = scmp.ne.s32.totalorder %s3053_s12, %s2532_s3  ;;  %p2537_p10 = scmp.lt.s32.totalorder %s3053_s12, %s3146_s8 }
 0x645   : > { %p2538_p6 = scmp.lt.s32.totalorder %s2536_s7, %s2532_s3 }
 0x646   : > { %p2534_p13 = pnand %p2533_p4, %p2764_p7 }
 0x647   : > { %p2539_p9 = por %p2538_p6, %p2537_p10 }
 0x648   : > { %p2535_p8 = pneg %p2534_p13 }
 0x64a   : > { %p2540_p1 = pnand %p2539_p9, %p2535_p8 }
 0x64c   : > { %2543 = shalt.err (!%p2540_p1)
}
 0x64d   : > { %2272 = dma.vmem_to_hbm [thread:$0]  (%p2764_p7), %s1940_s15, 128, %s3053_s12, %s1924_s21  }
 0x64e PF: > { %s3147_s1 = sld [smem:[#allocation16_spill]]  ;;  %p2294_p3 = scmp.ge.s32.totalorder %s2642_s25, 2 }
 0x64f   : > { %s3148_s29 = sld [smem:[#allocation18_spill]] }
 0x654   : > { %s1951_s18 = sand.u32 1, %s3147_s1  }
 0x655   : > { %p3149_p11 = scmp.ne.s32.totalorder %s3148_s29, 0  ;;  %s1952_s9 = scalar_lea.sflag [#allocation8], %s1951_s18 }
 0x657   : > { %p2286_p5 = pnand %p2294_p3, %p3149_p11 }
 0x659   : > { %p2287_p12 = pneg %p2286_p5 }
 0x65b   : > { %2597 = dma.done.wait (%p2287_p12), %s1952_s9, 128  }
 0x65c   : > { %2599 = vsyncadd (%p2287_p12), %s1952_s9, 4294967168  ;;  %s21_s25 = sadd.s32 1, %s2642_s25   ;;  %s3150_s21 = sld [smem:[#allocation17_spill]] }
 0x65d   : > { %p18_p0 = scmp.ge.s32.totalorder %s21_s25, 6   ;;  %s3151_s5 = sld [smem:[#allocation19_spill]] }
 0x65e   : > { %s3152_s15 = smov %s2606_s16  ;;  %s3153_s16 = smov %s2610_s17 }
 0x65f   : > { %s3154_s17 = smov %s2841_s23  ;;  %s3155_s18 = smov %s2618_s19 }
 0x660   : > { %s3156_s19 = smov %s2622_s20  ;;  %s3157_s20 = smov %s2836_s6 }
 0x661   : > { %s3158_s22 = smov %s2638_s24  ;;  %s3160_s24 = smov %s3166_s10 }
 0x662   :  { %20 = sbr.rel (!%p18_p0) target bundleno = 15 (0xf), region = 94 }
 0x663   : > { %s3159_s23 = smov %s3151_s5 }
 0x667   :  { %1957 = vsyncpa [#allocation7], 1 }
 0x668   :  { %1959 = vsyncpa [#allocation7 + $0x1], 1 }
 0x669   :  { %1960 = vsyncpa [#allocation10], 1 }
 0x66a   :  { %1961 = vsyncpa [#allocation8], 1 }
 0x66b   :  { %1963 = vsyncpa [#allocation8 + $0x1], 1 }

// kernel: tpu_custom_call.1
= control target key start
LH: loop header
LB: loop body
LE: loop exit
PB: predicated region body
PF: predicated region fallthrough
CT: control target
= control target key end

     0   :  { %s3112_s0 = inlined_call_operand.hbm [shape: f32[2,16,32], index: 0, kind: input, shape index: {}]   ;;  %s3113_s1 = inlined_call_operand.hbm [shape: f32[32,96], index: 1, kind: input, shape index: {}]   ;;  %s3114_s2 = inlined_call_operand.hbm [shape: f32[32,32], index: 2, kind: input, shape index: {}]   ;;  %s3115_s3 = inlined_call_operand.vmem [shape: f32[1,32], index: 3, kind: input, shape index: {}]   ;;  %s3116_s4 = inlined_call_operand.hbm [shape: f32[2,16,32], index: 4, kind: output, shape index: {}]  }
   0x1   :  { %3124 = sst [smem:[#allocation20_spill]] %s3113_s1 }
   0x2   :  { %3125 = sst [smem:[#allocation21_spill]] %s3114_s2 }
   0x3   :  { %3126 = sst [smem:[#allocation22_spill]] %s3115_s3 }
   0x4   :  { %3127 = sst [smem:[#allocation23_spill]] %s3116_s4 }
   0x5   :  { %9 = vsyncpa [#allocation7], 0 }
   0x6   :  { %11 = vsyncpa [#allocation7 + $0x1], 0 }
   0x7   :  { %12 = vsyncpa [#allocation10], 0 }
   0x8   :  { %13 = vsyncpa [#allocation8], 0 }
   0x9   :  { %15 = vsyncpa [#allocation8 + $0x1], 0  ;;  %s2693_s15 = smov 0   ;;  %s2695_s16 = smov 0  }
   0xa   :  { %s2697_s17 = smov 0   ;;  %s2699_s18 = smov 0  }
   0xb   :  { %s2701_s19 = smov 0   ;;  %s2703_s20 = smov 0  }
   0xc   :  { %s2705_s21 = smov 0   ;;  %s2707_s22 = smov 0  }
   0xd   :  { %s2709_s23 = smov 0   ;;  %s2711_s24 = smov 0  }
   0xe   :  { %s2713_s25 = smov 0  }
   0xf LB: > { %3128 = sst [smem:[#allocation16_spill]] %s2602_s15  ;;  %s2043_s26 = sadd.s32 4294967295, %s2642_s25   ;;  %s2642_s25 = sphi %s2713_s25, %s21_s25   ;;  %s2638_s24 = sphi %s2711_s24, %s3160_s24   ;;  %s2634_s23 = sphi %s2709_s23, %s3159_s23   ;;  %s2630_s22 = sphi %s2707_s22, %s3158_s22   ;;  %s2626_s21 = sphi %s2705_s21, %s3150_s21   ;;  %s2622_s20 = sphi %s2703_s20, %s3157_s20   ;;  %s2618_s19 = sphi %s2701_s19, %s3156_s19   ;;  %s2614_s18 = sphi %s2699_s18, %s3155_s18   ;;  %s2610_s17 = sphi %s2697_s17, %s3154_s17   ;;  %s2606_s16 = sphi %s2695_s16, %s3153_s16   ;;  %s2602_s15 = sphi %s2693_s15, %s3152_s15  }
  0x10   : > { %3129 = sst [smem:[#allocation17_spill]] %s2634_s23  ;;  %s2044_s27 = sadd.s32 4294967294, %s2642_s25  }
  0x11   : > { %p53_p0 = scmp.ne.s32.totalorder %s2618_s19, %s2614_s18  ;;  %p2749_p1 = scmp.eq.s32.totalorder %s2043_s26, 0 }
  0x12   : > { %p141_p2 = scmp.ne.s32.totalorder %s2610_s17, %s2606_s16  ;;  %p142_p4 = scmp.eq.s32.totalorder %s2043_s26, 3 }
  0x13   : > { %p2758_p3 = por %p2749_p1, %p53_p0  ;;  %p147_p5 = scmp.ne.s32.totalorder %s2606_s16, %s2602_s15 }
  0x14   : > { %p148_p6 = scmp.eq.s32.totalorder %s2044_s27, 3  ;;  %p2764_p7 = por %p142_p4, %p141_p2 }
  0x15   : > { %p2045_p8 = scmp.ge.s32.totalorder %s2642_s25, 1  ;;  %p155_p10 = scmp.lt.s32.totalorder %s2642_s25, 5 }
  0x16   : > { %p2769_p9 = por %p148_p6, %p147_p5  ;;  %s2644_s8 = smov [#allocation9]  }
  0x17   : > { %p2774_p11 = pnand %p2045_p8, %p155_p10  ;;  %s167_s9 = sshll.u32 %s2644_s8, 4  ;;  %s168_s9 = int_to_ptr.vmem [resolvable:$true] %s167_s9 }
  0x18   : > { %s3133_s6 = scalar_select %p2769_p9, 1, 0 }
  0x19   : > { %p2274_p12 = pneg %p2774_p11  ;;  %s2645_s11 = smov [#allocation11]  }
  0x1a   : > { %3134 = sst [smem:[#allocation18_spill]] %s3133_s6  ;;  %s180_s12 = sshll.u32 %s2645_s11, 4  ;;  %s181_s12 = int_to_ptr.vmem [resolvable:$true] %s180_s12 }
  0x1b   : > { %p2782_p13 = pnand %p2274_p12, %p2749_p1  ;;  %s2449_s13 = scalar_lea.vmem %s168_s9, 512 }
  0x1c   : > { %p2450_p2 = scmp.ne.s32.totalorder %s168_s9, %s2449_s13  ;;  %p2457_p6 = scmp.lt.s32.totalorder %s168_s9, %s168_s9 }
  0x1d   : > { %p2440_p0 = pneg %p2782_p13  ;;  %p2458_p8 = scmp.lt.s32.totalorder %s2449_s13, %s2449_s13 }
  0x1f   : > { %p2452_p4 = pnand %p2450_p2, %p2440_p0  ;;  %p2459_p10 = por %p2458_p8, %p2457_p6 }
  0x21   : > { %p2453_p5 = pneg %p2452_p4 }
  0x23   : > { %p2460_p12 = pnand %p2459_p10, %p2453_p5 }
  0x25   : > { %2463 = shalt.err (!%p2460_p12)
}
  0x26   : > { %s3117_s14 = smov 128   ;;  %s3118_s18 = smov 8  }
  0x27   : > { %s3137_s1 = sld [smem:[#allocation20_spill]]  ;;  %s2475_s8 = scalar_lea.vmem %s181_s12, 512 }
  0x28   : > { %p2476_p2 = scmp.ne.s32.totalorder %s181_s12, %s2475_s8  ;;  %p2483_p5 = scmp.lt.s32.totalorder %s181_s12, %s181_s12 }
  0x29   : > { %p2484_p8 = scmp.lt.s32.totalorder %s2475_s8, %s2475_s8 }
  0x2a   : > { %p2478_p4 = pnand %p2476_p2, %p2440_p0 }
  0x2b   : > { %p2485_p10 = por %p2484_p8, %p2483_p5 }
  0x2c   : > { %p2479_p6 = pneg %p2478_p4 }
  0x2d   : > { %2277 = dma.hbm_to_vmem [thread:$0]  (!%p2782_p13), %s3137_s1, 512, %s168_s9, [#allocation10], %s3117_s14, %s3117_s14, %s3118_s18  }
  0x2e   : > { %p2486_p12 = pnand %p2485_p10, %p2479_p6 }
  0x30   : > { %2489 = shalt.err (!%p2486_p12)
}
  0x31   : > { %s3138_s2 = sld [smem:[#allocation21_spill]]  ;;  %s30_s9 = sadd.s32 1, %s2634_s23 }
  0x32   : > { %s33_s10 = sadd.s32 1, %s2638_s24  ;;  %p31_p0 = scmp.ge.s32.totalorder %s30_s9, 2 }
  0x33   : > { %s40_s26 = sadd.s32 1, %s2622_s20  ;;  %p47_p2 = scmp.ne.s32.totalorder %s2622_s20, %s2618_s19 }
  0x34   : > { %p48_p4 = scmp.eq.s32.totalorder %s2642_s25, 0  ;;  %s3162_s9 = smov (%p31_p0, %s30_s9), 0 }
  0x35   : > { %3139 = sst [smem:[#allocation19_spill]] %s3162_s9  ;;  %s3164_s10 = smov (!%p31_p0, %s33_s10), %s2638_s24 }
  0x36   : > { %p2819_p6 = por %p48_p4, %p47_p2  ;;  %s127_s8 = ssub.s32 %s2634_s23, %s3162_s9 }
  0x37   : > { %2280 = dma.hbm_to_vmem [thread:$0]  (!%p2782_p13), %s3138_s2, 512, %s181_s12, [#allocation10], %s3117_s14, %s3117_s14, %s3118_s18  }
  0x38   : > { %p35_p13 = scmp.ge.s32.totalorder %s3164_s10, 2  ;;  %p2291_p5 = scmp.lt.s32.totalorder %s2642_s25, 4 }
  0x39   : > { %s197_s12 = sand.u32 1, %s2622_s20   ;;  %s2092_s11 = sshll.u32 %s2638_s24, 8 }
  0x3a   : > { %s3166_s10 = smov (%p35_p13, %s3164_s10), 0  ;;  %s2049_s13 = sshll.u32 %s197_s12, 4 }
  0x3b   : > { %s37_s14 = ssub.s32 %s2638_s24, %s3166_s10  ;;  %s207_s2 = scalar_lea.hbm %s3112_s0, %s2092_s11 }
  0x3c   : > { %p38_p8 = scmp.eq.s32.totalorder %s37_s14, 0  ;;  %s128_s18 = sor.u32 %s127_s8, %s37_s14 }
  0x3d   : > { %p129_p10 = scmp.eq.s32.totalorder %s128_s18, 0  ;;  %s3141_s9 = sadd.s32 1, %s2610_s17 }
  0x3e   : > { %s2836_s6 = scalar_select %p38_p8, %s2622_s20, %s40_s26  }
  0x3f   : > { %s2841_s23 = scalar_select %p129_p10, %s2610_s17, %s3141_s9  }
  0x40   : > { %s201_s15 = scalar_lea.vmem [#allocation6], %s2049_s13  ;;  %p2847_p12 = pnand %p2291_p5, %p2819_p6 }
  0x41   : > { %s208_s4 = sshll.u32 %s201_s15, 4  ;;  %s198_s14 = scalar_lea.sflag [#allocation7], %s197_s12  ;;  %s209_s4 = int_to_ptr.vmem [resolvable:$true] %s208_s4 }
  0x42   : > { %p2492_p0 = pneg %p2847_p12  ;;  %s2503_s1 = scalar_lea.vmem %s209_s4, 256 }
  0x43   : > { %p2504_p2 = scmp.ne.s32.totalorder %s209_s4, %s2503_s1  ;;  %s2648_s29 = smov [#allocation6]  }
  0x44   : > { %s2508_s18 = sshll.u32 %s2648_s29, 4  ;;  %s2509_s18 = int_to_ptr.vmem [resolvable:$false] %s2508_s18 }
  0x45   : > { %p2506_p4 = pnand %p2504_p2, %p2492_p0  ;;  %s2510_s9 = scalar_lea.vmem %s2509_s18, 512 }
  0x46   : > { %p2511_p8 = scmp.lt.s32.totalorder %s209_s4, %s2509_s18  ;;  %p2512_p10 = scmp.lt.s32.totalorder %s2510_s9, %s2503_s1 }
  0x47   : > { %p2507_p13 = pneg %p2506_p4 }
  0x48   : > { %p2513_p9 = por %p2512_p10, %p2511_p8 }
  0x4a   : > { %p2514_p6 = pnand %p2513_p9, %p2507_p13 }
  0x4c   : > { %2517 = shalt.err (!%p2514_p6)
}
  0x4d   : > { %s3143_s15 = smov 8   ;;  %s3144_s26 = smov 128  }
  0x4e   : > { %2284 = dma.hbm_to_vmem [thread:$0]  (!%p2847_p12), %s207_s2, 256, %s209_s4, %s198_s14, %s3144_s26, %s3144_s26, %s3143_s15  }
  0x4f   : > { %220 = sbr.rel (%p2774_p11) target bundleno = 1614 (0x64e), region = 36  ;;  %s222_s27 = sand.u32 (!%p2774_p11), 1, %s2618_s19  }
  0x50   : > { %s2053_s8 = sshll.u32 (!%p2774_p11), %s222_s27, 4  ;;  %s223_s12 = scalar_lea.sflag (!%p2774_p11), [#allocation7], %s222_s27 }
  0x51   : > { %s226_s11 = scalar_lea.vmem (!%p2774_p11), [#allocation6], %s2053_s8 }
  0x54   : > { %2589 = dma.done.wait (%p2758_p3), %s223_s12, 256  }
  0x55   : > { %2591 = vsyncadd (%p2758_p3), %s223_s12, 4294967040 }
  0x56   : > { %2593 = dma.done.wait (%p2749_p1), [#allocation10], 1024  }
  0x57   : > { %2595 = vsyncadd (%p2749_p1), [#allocation10], 4294966272  ;;  %s256_s2 = sand.u32 1, %s2606_s16   ;;  %p2057_p9 = scmp.ne.s32.totalorder %s2626_s21, 0 }
  0x58   : > { %s2872_s3 = sshll.u32 %s256_s2, 3  ;;  %s2649_s28 = smov (!%p2057_p9), 64  }
  0x59   : > { %s258_s4 = scalar_lea.vmem [#allocation12], %s2872_s3  ;;  %262 = sbr.rel (%p2057_p9) target bundleno = 551 (0x227), region = 52 }
  0x5a   : > { %s2650_s30 = smov (!%p2057_p9), 96  }
  0x5e   : > { %v268_v0 = vld [vmem:[#allocation9 + $0x18] sm:$0xff]  ;;  %v267_v1 = vld [vmem:[#allocation9 + $0x10] sm:$0xff]  ;;  %vm269_vm0 = vcmask 261120   ;;  %v266_v3 = vld [vmem:[#allocation9 + $0x8] sm:$0xff]  ;;  %vm401_vm1 = vcmask 130048  }
  0x5f   : > { %2144 = vmatprep.subr.mxu0 %v268_v0  ;;  %v263_v2 = vld [vmem:[%s226_s11] sm:$0xff]  ;;  %v264_v5 = vld [vmem:[%s226_s11 + $0x8] sm:$0xff] }
  0x60   : > { %2145 = vmatpush3.msra.mxu0 %v268_v0  ;;  %2152 = vmatprep.mubr.msk.f32.mxu0 %vm269_vm0, %v263_v2  ;;  %v265_v4 = vld [vmem:[#allocation9] sm:$0xff] }
  0x61   : > { %2146 = vmatprep.subr.mxu0 %v267_v1 }
  0x62   : > { %2147 = vmatpush3.msra.mxu0 %v267_v1 }
  0x63   : > { %2148 = vmatprep.subr.mxu0 %v266_v3 }
  0x64   : > { %2149 = vmatpush3.msra.mxu0 %v266_v3 }
  0x65   : > { %2150 = vmatprep.subr.mxu0 %v265_v4 }
  0x66   : > { %2151 = vmatpush3.msra.mxu0 %v265_v4 }
  0x67   : > { %2153 = vmatmul.mubr.msk.f32.vlgmr.msra.gmra.mxu0 %vm269_vm0, %v264_v5 }
 0x127   : > { %v2154_v6 = vpop.f32.mrf.mxu0 }
 0x128   : > { %352 = vst.msk [vmem:[#allocation2 + $0x8] sm:$0xff] %vm269_vm0, %v2154_v6 }
 0x129   : > { %v342_v7 = vpop.f32.mrf.mxu0 }
 0x12a   : > { %351 = vst.msk [vmem:[#allocation2] sm:$0xff] %vm269_vm0, %v342_v7  ;;  %355 = vrot.lane.b32.xlu1 %v342_v7, %s2649_s28  ;;  %363 = vrot.lane.b32.xlu0 %v342_v7, %s2650_s30 }
 0x12e   : > { %357 = vrot.lane.b32.xlu1 %v2154_v6, %s2649_s28  ;;  %365 = vrot.lane.b32.xlu0 %v2154_v6, %s2650_s30 }
 0x19c   : > { %v356_v8 = vpop.permute.xlu1 %355  ;;  %v364_v9 = vpop.permute.xlu0 %363 }
 0x19d   : > { %361 = vst.msk [vmem:[#allocation4] sm:$0xff] %vm269_vm0, %v356_v8  ;;  %369 = vxpose.xlu0.b32.start [1/2] (short) (narrow) %v364_v9, 32 }
 0x1a0   : > { %v358_v10 = vpop.permute.xlu1 %357  ;;  %v366_v11 = vpop.permute.xlu0 %365 }
 0x1a1   : > { %362 = vst.msk [vmem:[#allocation4 + $0x8] sm:$0xff] %vm269_vm0, %v358_v10  ;;  %370 = vxpose.xlu0.b32.end [2/2] (short) (narrow) %v366_v11, 32 }
 0x219   : > { %v385_v12 = vpop.trf.xlu0 }
 0x21a   : > { %402 = vst.msk [vmem:[#allocation3] sm:$0xff] %vm401_vm1, %v385_v12 }
 0x21d   : > { %v386_v13 = vpop.trf.xlu0 }
 0x21e   : > { %403 = vst.msk [vmem:[#allocation3 + $0x8] sm:$0xff] %vm401_vm1, %v386_v13 }
 0x221   : > { %v387_v14 = vpop.trf.xlu0 }
 0x222   : > { %404 = vst.msk [vmem:[#allocation3 + $0x10] sm:$0xff] %vm401_vm1, %v387_v14 }
 0x225   : > { %v388_v15 = vpop.trf.xlu0 }
 0x226   : > { %405 = vst.msk [vmem:[#allocation3 + $0x18] sm:$0xff] %vm401_vm1, %v388_v15 }
 0x227 PF: > { %v409_v16 = vld [vmem:[#allocation3] sm:$0xf]  ;;  %vm416_vm2 = vcmask 1043456   ;;  %s2060_s7 = sshll.u32 %s2626_s21, 3  ;;  %v2651_v17 = vmov 0.0   ;;  %vm2652_vm3 = vmmov 0  }
 0x228   : > { %2155 = vmatprep.subr.mxu1 %v2651_v17  ;;  %2157 = vmatprep.mubr.msk.f32.mxu1 %vm2652_vm3, %v2651_v17  ;;  %vm412_vm4 = vcmask 31744   ;;  %v577_v18 = vld [vmem:[#allocation3 + $0x4] sm:$0xf]  ;;  %s407_s13 = scalar_lea.vmem [#allocation2], %s2060_s7  ;;  %s2653_s14 = smov 124   ;;  %v2893_v20 = vld [vmem:[#allocation4 + $0x8] sm:$0xff] }
 0x229   : > { %2156 = vmatpush3.msk.msra.mxu1 %vm416_vm2, %v409_v16  ;;  %v576_v19 = vld [vmem:[%s407_s13] sm:$0xff]  ;;  %2167 = vmatprep.subr.mxu0 %v2651_v17  ;;  %s2654_s1 = smov 116   ;;  %s2655_s29 = smov 120   ;;  %v2899_v21 = vld [vmem:[#allocation4] sm:$0xff]  ;;  %v757_v22 = vld [vmem:[#allocation3 + $0x8] sm:$0xf] }
 0x22a   : > { %581 = vrot.lane.b32.xlu0 %v576_v19, %s2653_s14  ;;  %2158 = vmatmul.mubr.msk.f32.vlgmr.msra.gmra.mxu1 %vm412_vm4, %v576_v19  ;;  %s2656_s18 = smov 112   ;;  %s2657_s9 = smov 108   ;;  %v937_v24 = vld [vmem:[#allocation3 + $0xc] sm:$0xf]  ;;  %v1117_v27 = vld [vmem:[#allocation3 + $0x10] sm:$0xf] }
 0x22b   : > { %941 = vrot.lane.b32.xlu1 %v576_v19, %s2654_s1  ;;  %2168 = vmatpush3.msk.msra.mxu0 %vm416_vm2, %v577_v18  ;;  %s2658_s15 = smov 104   ;;  %s2659_s26 = smov 100   ;;  %v1297_v29 = vld [vmem:[#allocation3 + $0x14] sm:$0xf]  ;;  %vm490_vm5 = vcmask 130048   ;;  %vm754_vm6 = vcmask 64544  }
 0x22c   : > { %2169 = vmatprep.mubr.msk.f32.mxu0 %vm2652_vm3, %v2651_v17  ;;  %2179 = vmatprep.subr.mxu0 %v2651_v17  ;;  %s2660_s27 = smov 4   ;;  %s2661_s8 = smov 8   ;;  %vm934_vm7 = vcmask 97344   ;;  %vm1114_vm8 = vcmask 130144   ;;  %vm1294_vm9 = vcmask 162944   ;;  %vm1474_vm10 = vcmask 195744  }
 0x22d   : > { %2160 = vmatprep.subr.mxu1 %v2651_v17  ;;  %2164 = vmatprep.mubr.msk.f32.mxu1 %vm2652_vm3, %v2651_v17  ;;  %v1477_v31 = vld [vmem:[#allocation3 + $0x18] sm:$0xf]  ;;  %v1657_v33 = vld [vmem:[#allocation3 + $0x1c] sm:$0xf]  ;;  %s2662_s12 = smov 12   ;;  %s2663_s11 = smov 16  }
 0x22e   : > { %761 = vrot.lane.b32.xlu0 %v576_v19, %s2655_s29  ;;  %2161 = vmatpush3.msra.mxu1 %v2893_v20  ;;  %s2664_s28 = smov 20   ;;  %s2665_s30 = smov 24   ;;  %vm1654_vm11 = vcmask 228544   ;;  %vm1834_vm12 = vcmask 261344   ;;  %vm1848_vm13 = vcmask 261120  }
 0x22f   : > { %1121 = vrot.lane.b32.xlu1 %v576_v19, %s2656_s18  ;;  %2162 = vmatprep.subr.mxu1 %v2651_v17  ;;  %s2666_s7 = smov 28   ;;  %s2088_s13 = sshll.u32 %s2630_s22, 1 }
 0x230   : > { %2163 = vmatpush3.msra.mxu1 %v2899_v21 }
 0x231   : > { %2172 = vmatprep.subr.mxu1 %v2651_v17 }
 0x232   : > { %1301 = vrot.lane.b32.xlu0 %v576_v19, %s2657_s9 }
 0x233   : > { %1481 = vrot.lane.b32.xlu1 %v576_v19, %s2658_s15 }
 0x236   : > { %1661 = vrot.lane.b32.xlu0 %v576_v19, %s2659_s26 }
 0x237   : > { %669 = vrot.lane.b32.xlu1 %v2899_v21, %s2653_s14 }
 0x23a   : > { %671 = vrot.lane.b32.xlu0 %v2893_v20, %s2653_s14  ;;  %s1935_s14 = sadd.s32 %s2626_s21, %s2088_s13  ;;  %s1924_s21 = scalar_lea.sflag [#allocation8], %s256_s2 }
 0x23b   : > { %851 = vrot.lane.b32.xlu1 %v2893_v20, %s2655_s29 }
 0x23e   : > { %849 = vrot.lane.b32.xlu0 %v2899_v21, %s2655_s29 }
 0x23f   : > { %1031 = vrot.lane.b32.xlu1 %v2893_v20, %s2654_s1 }
 0x242   : > { %1029 = vrot.lane.b32.xlu0 %v2899_v21, %s2654_s1 }
 0x243   : > { %1211 = vrot.lane.b32.xlu1 %v2893_v20, %s2656_s18 }
 0x246   : > { %1209 = vrot.lane.b32.xlu0 %v2899_v21, %s2656_s18  ;;  %s3145_s18 = sld [smem:[#allocation22_spill]] }
 0x247   : > { %1391 = vrot.lane.b32.xlu1 %v2893_v20, %s2657_s9 }
 0x29c   : > { %v582_v23 = vpop.permute.xlu0 %581 }
 0x29d   : > { %2170 = vmatmul.mubr.msk.f32.vlgmr.msra.gmra.mxu0 %vm412_vm4, %v582_v23  ;;  %v942_v26 = vpop.permute.xlu1 %941 }
 0x29e   : > { %2180 = vmatpush3.msk.msra.mxu0 %vm416_vm2, %v757_v22  ;;  %2181 = vmatprep.mubr.msk.f32.mxu0 %vm2652_vm3, %v2651_v17 }
 0x29f   : > { %2191 = vmatprep.subr.mxu0 %v2651_v17 }
 0x2a0   : > { %v762_v25 = vpop.permute.xlu0 %761 }
 0x2a1   : > { %2182 = vmatmul.mubr.msk.f32.vlgmr.msra.gmra.mxu0 %vm412_vm4, %v762_v25  ;;  %v1122_v28 = vpop.permute.xlu1 %1121 }
 0x2a2   : > { %2192 = vmatpush3.msk.msra.mxu0 %vm416_vm2, %v937_v24  ;;  %2193 = vmatprep.mubr.msk.f32.mxu0 %vm2652_vm3, %v2651_v17 }
 0x2a3   : > { %2203 = vmatprep.subr.mxu0 %v2651_v17 }
 0x2a4   : > { %v1302_v30 = vpop.permute.xlu0 %1301 }
 0x2a5   : > { %2194 = vmatmul.mubr.msk.f32.vlgmr.msra.gmra.mxu0 %vm412_vm4, %v942_v26  ;;  %v1482_v32 = vpop.permute.xlu1 %1481 }
 0x2a6   : > { %2204 = vmatpush3.msk.msra.mxu0 %vm416_vm2, %v1117_v27  ;;  %2205 = vmatprep.mubr.msk.f32.mxu0 %vm2652_vm3, %v2651_v17 }
 0x2a7   : > { %2215 = vmatprep.subr.mxu0 %v2651_v17 }
 0x2a8   : > { %v1662_v34 = vpop.permute.xlu0 %1661 }
 0x2a9   : > { %2206 = vmatmul.mubr.msk.f32.vlgmr.msra.gmra.mxu0 %vm412_vm4, %v1122_v28  ;;  %v670_v38 = vpop.permute.xlu1 %669 }
 0x2aa   : > { %2216 = vmatpush3.msk.msra.mxu0 %vm416_vm2, %v1297_v29  ;;  %2217 = vmatprep.mubr.msk.f32.mxu0 %vm2652_vm3, %v2651_v17 }
 0x2ab   : > { %2227 = vmatprep.subr.mxu0 %v2651_v17 }
 0x2ac   : > { %v672_v0 = vpop.permute.xlu0 %671 }
 0x2ad   : > { %2218 = vmatmul.mubr.msk.f32.vlgmr.msra.gmra.mxu0 %vm412_vm4, %v1302_v30  ;;  %v2951_v40 = vpop.permute.xlu1 %851 }
 0x2ae   : > { %2228 = vmatpush3.msk.msra.mxu0 %vm416_vm2, %v1477_v31  ;;  %2229 = vmatprep.mubr.msk.f32.mxu0 %vm2652_vm3, %v2651_v17 }
 0x2af   : > { %2239 = vmatprep.subr.mxu0 %v2651_v17 }
 0x2b0   : > { %v850_v5 = vpop.permute.xlu0 %849 }
 0x2b1   : > { %2230 = vmatmul.mubr.msk.f32.vlgmr.msra.gmra.mxu0 %vm412_vm4, %v1482_v32  ;;  %v2955_v46 = vpop.permute.xlu1 %1031 }
 0x2b2   : > { %2240 = vmatpush3.msk.msra.mxu0 %vm416_vm2, %v1657_v33  ;;  %2241 = vmatprep.mubr.msk.f32.mxu0 %vm2652_vm3, %v2651_v17 }
 0x2b3   : > { %2251 = vmatprep.subr.mxu0 %v2651_v17 }
 0x2b4   : > { %v1030_v6 = vpop.permute.xlu0 %1029 }
 0x2b5   : > { %2242 = vmatmul.mubr.msk.f32.vlgmr.msra.gmra.mxu0 %vm412_vm4, %v1662_v34  ;;  %v2958_v51 = vpop.permute.xlu1 %1211 }
 0x2b6   : > { %2259 = vmatprep.mubr.msk.f32.mxu0 %vm2652_vm3, %v2651_v17 }
 0x2b8   : > { %v1210_v7 = vpop.permute.xlu0 %1209 }
 0x2b9   : > { %v2963_v55 = vpop.permute.xlu1 %1391 }
 0x2ea   : > { %v486_v35 = vpop.f32.mrf.mxu1 }
 0x2eb   : > { %v491_v36 = vsel %vm490_vm5, %v486_v35, -inf }
 0x2ec   : > { %492 = vmax.xlane.f32.xlu1 %v491_v36  ;;  %v2159_v37 = vpop.f32.mrf.mxu1 }
 0x35d   : > { %v654_v39 = vpop.f32.mrf.mxu0 }
 0x35e   : > { %v658_v41 = vsel %vm490_vm5, %v654_v39, -inf }
 0x35f   : > { %659 = vmax.xlane.f32.xlu0 %v658_v41  ;;  %v2171_v42 = vpop.f32.mrf.mxu0 }
 0x361   : > { %v834_v43 = vpop.f32.mrf.mxu0 }
 0x362   : > { %v838_v44 = vsel %vm490_vm5, %v834_v43, -inf }
 0x363   : > { %839 = vmax.xlane.f32.xlu0 %v838_v44  ;;  %v2183_v45 = vpop.f32.mrf.mxu0 }
 0x365   : > { %v1014_v47 = vpop.f32.mrf.mxu0 }
 0x366   : > { %v1018_v48 = vsel %vm490_vm5, %v1014_v47, -inf }
 0x367   : > { %v2195_v49 = vpop.f32.mrf.mxu0  ;;  %1019 = vmax.xlane.f32.xlu1 %v1018_v48 }
 0x369   : > { %v1194_v50 = vpop.f32.mrf.mxu0 }
 0x36a   : > { %v1198_v52 = vsel %vm490_vm5, %v1194_v50, -inf }
 0x36b   : > { %1199 = vmax.xlane.f32.xlu0 %v1198_v52  ;;  %v2207_v53 = vpop.f32.mrf.mxu0 }
 0x36d   : > { %v2961_v54 = vpop.f32.mrf.mxu0 }
 0x36e   : > { %v1378_v2 = vsel %vm490_vm5, %v2961_v54, -inf }
 0x36f   : > { %v2219_v56 = vpop.f32.mrf.mxu0 }
 0x371   : > { %v2965_v57 = vpop.f32.mrf.mxu0 }
 0x372   : > { %v1558_v3 = vsel %vm490_vm5, %v2965_v57, -inf }
 0x373   : > { %v2231_v58 = vpop.f32.mrf.mxu0 }
 0x375   : > { %v493_v59 = vpop.xlane.xlu1 %492  ;;  %v2967_v60 = vpop.f32.mrf.mxu0 }
 0x376   : > { %v494_v61 = vsub.f32 %v486_v35, %v493_v59  ;;  %v1738_v4 = vsel %vm490_vm5, %v2967_v60, -inf }
 0x377   : > { %v2243_v62 = vpop.f32.mrf.mxu0 }
 0x378   : > { %v495_v63 = vmul.f32 1.442695, %v494_v61  ;;  %1571 = vrot.lane.b32.xlu1 %v2893_v20, %s2658_s15 }
 0x37a   : > { %2406 = vpow2.f32 %v495_v63 }
 0x381   : > { %1389 = vrot.lane.b32.xlu0 %v2899_v21, %s2657_s9  ;;  %s2089_s9 = sshll.u32 %s1935_s14, 7 }
 0x387   : > { %v2973_v1 = vpop.eup %2406 }
 0x388   : > { %2165 = vmatmul.mubr.msk.f32.vlgmr.msra.gmra.mxu1 %vm490_vm5, %v2973_v1  ;;  %v497_v49 = vsel %vm490_vm5, %v2973_v1, 0.0 }
 0x389   : > { %2173 = vmatpush3.msra.mxu1 %v672_v0  ;;  %2176 = vmatprep.mubr.msk.f32.mxu1 %vm2652_vm3, %v2651_v17 }
 0x38a   : > { %2174 = vmatprep.subr.mxu1 %v2651_v17 }
 0x38b   : > { %2175 = vmatpush3.msra.mxu1 %v670_v38 }
 0x38c   : > { %2184 = vmatprep.subr.mxu1 %v2651_v17 }
 0x39c   : > { %1379 = vmax.xlane.f32.xlu1 %v1378_v2 }
 0x3a0   : > { %1559 = vmax.xlane.f32.xlu0 %v1558_v3  ;;  %1739 = vmax.xlane.f32.xlu1 %v1738_v4 }
 0x3b1   : > { %1751 = vrot.lane.b32.xlu1 %v2893_v20, %s2659_s26 }
 0x3b6   : > { %1569 = vrot.lane.b32.xlu0 %v2899_v21, %s2658_s15  ;;  %s1939_s15 = sshll.u32 %s258_s4, 4  ;;  %s1940_s15 = int_to_ptr.vmem [resolvable:$true] %s1939_s15 }
 0x3b7   : > { %s2518_s22 = scalar_lea.vmem %s1940_s15, 128 }
 0x3b8   : > { %p2519_p1 = scmp.ne.s32.totalorder %s1940_s15, %s2518_s22 }
 0x3ba   : > { %1749 = vrot.lane.b32.xlu0 %v2899_v21, %s2659_s26  ;;  %p2520_p3 = pnand %p2519_p1, %p2764_p7 }
 0x3bc   : > { %p2521_p11 = pneg %p2520_p3 }
 0x3e8   : > { %v660_v8 = vpop.xlane.xlu0 %659 }
 0x3e9   : > { %v661_v9 = vsub.f32 %v654_v39, %v660_v8 }
 0x3eb   : > { %v662_v10 = vmul.f32 1.442695, %v661_v9 }
 0x3ec   : > { %v840_v11 = vpop.xlane.xlu0 %839 }
 0x3ed   : > { %2408 = vpow2.f32 %v662_v10  ;;  %v841_v12 = vsub.f32 %v834_v43, %v840_v11 }
 0x3ef   : > { %v842_v13 = vmul.f32 1.442695, %v841_v12 }
 0x3f0   : > { %v1020_v14 = vpop.xlane.xlu1 %1019 }
 0x3f1   : > { %2410 = vpow2.f32 %v842_v13  ;;  %v1021_v15 = vsub.f32 %v1014_v47, %v1020_v14  ;;  %v1840_v14 = vld [vmem:[#allocation11 + $0x18] sm:$0xff] }
 0x3f2   : > { %2252 = vmatpush3.msra.mxu0 %v1840_v14 }
 0x3f3   : > { %v1022_v16 = vmul.f32 1.442695, %v1021_v15  ;;  %v1839_v15 = vld [vmem:[#allocation11 + $0x10] sm:$0xff]  ;;  %2253 = vmatprep.subr.mxu0 %v2651_v17 }
 0x3f4   : > { %v1200_v18 = vpop.xlane.xlu0 %1199  ;;  %v1572_v30 = vpop.permute.xlu1 %1571  ;;  %2254 = vmatpush3.msra.mxu0 %v1839_v15 }
 0x3f5   : > { %2412 = vpow2.f32 %v1022_v16  ;;  %v1201_v19 = vsub.f32 %v1194_v50, %v1200_v18  ;;  %2255 = vmatprep.subr.mxu0 %v2651_v17 }
 0x3f7   : > { %v1202_v20 = vmul.f32 1.442695, %v1201_v19  ;;  %v1838_v19 = vld [vmem:[#allocation11 + $0x8] sm:$0xff] }
 0x3f8   : > { %v1390_v29 = vpop.permute.xlu0 %1389  ;;  %2256 = vmatpush3.msra.mxu0 %v1838_v19 }
 0x3f9   : > { %2414 = vpow2.f32 %v1202_v20  ;;  %2257 = vmatprep.subr.mxu0 %v2651_v17 }
 0x3fa   : > { %v2409_v21 = vpop.eup %2408 }
 0x3fb   : > { %2177 = vmatmul.mubr.msk.f32.vlgmr.msra.gmra.mxu1 %vm490_vm5, %v2409_v21  ;;  %v664_v22 = vsel %vm490_vm5, %v2409_v21, 0.0 }
 0x3fc   : > { %2185 = vmatpush3.msra.mxu1 %v2951_v40  ;;  %665 = vadd.xlane.f32.xlu1 %v664_v22  ;;  %v1837_v22 = vld [vmem:[#allocation11] sm:$0xff] }
 0x3fd   : > { %2186 = vmatprep.subr.mxu1 %v2651_v17  ;;  %2188 = vmatprep.mubr.msk.f32.mxu1 %vm2652_vm3, %v2651_v17 }
 0x3fe   : > { %v2411_v23 = vpop.eup %2410  ;;  %2187 = vmatpush3.msra.mxu1 %v850_v5  ;;  %2258 = vmatpush3.msra.mxu0 %v1837_v22 }
 0x3ff   : > { %2196 = vmatprep.subr.mxu1 %v2651_v17  ;;  %2189 = vmatmul.mubr.msk.f32.vlgmr.msra.gmra.mxu1 %vm490_vm5, %v2411_v23  ;;  %v844_v24 = vsel %vm490_vm5, %v2411_v23, 0.0 }
 0x400   : > { %2197 = vmatpush3.msra.mxu1 %v2955_v46  ;;  %845 = vadd.xlane.f32.xlu0 %v844_v24 }
 0x401   : > { %2198 = vmatprep.subr.mxu1 %v2651_v17  ;;  %2200 = vmatprep.mubr.msk.f32.mxu1 %vm2652_vm3, %v2651_v17 }
 0x402   : > { %v2413_v25 = vpop.eup %2412  ;;  %2199 = vmatpush3.msra.mxu1 %v1030_v6 }
 0x403   : > { %2208 = vmatprep.subr.mxu1 %v2651_v17  ;;  %2201 = vmatmul.mubr.msk.f32.vlgmr.msra.gmra.mxu1 %vm490_vm5, %v2413_v25  ;;  %v1024_v26 = vsel %vm490_vm5, %v2413_v25, 0.0 }
 0x404   : > { %2209 = vmatpush3.msra.mxu1 %v2958_v51  ;;  %1025 = vadd.xlane.f32.xlu0 %v1024_v26 }
 0x405   : > { %2210 = vmatprep.subr.mxu1 %v2651_v17  ;;  %2212 = vmatprep.mubr.msk.f32.mxu1 %vm2652_vm3, %v2651_v17 }
 0x406   : > { %v2415_v27 = vpop.eup %2414  ;;  %2211 = vmatpush3.msra.mxu1 %v1210_v7 }
 0x407   : > { %2220 = vmatprep.subr.mxu1 %v2651_v17  ;;  %2213 = vmatmul.mubr.msk.f32.vlgmr.msra.gmra.mxu1 %vm490_vm5, %v2415_v27  ;;  %v1204_v28 = vsel %vm490_vm5, %v2415_v27, 0.0 }
 0x408   : > { %2221 = vmatpush3.msra.mxu1 %v2963_v55  ;;  %1205 = vadd.xlane.f32.xlu1 %v1204_v28 }
 0x409   : > { %2222 = vmatprep.subr.mxu1 %v2651_v17  ;;  %2224 = vmatprep.mubr.msk.f32.mxu1 %vm2652_vm3, %v2651_v17 }
 0x40a   : > { %2223 = vmatpush3.msra.mxu1 %v1390_v29 }
 0x40b   : > { %2232 = vmatprep.subr.mxu1 %v2651_v17 }
 0x425   : > { %v1380_v31 = vpop.xlane.xlu1 %1379 }
 0x426   : > { %v1381_v32 = vsub.f32 %v2961_v54, %v1380_v31 }
 0x428   : > { %v1382_v33 = vmul.f32 1.442695, %v1381_v32 }
 0x429   : > { %v1560_v34 = vpop.xlane.xlu0 %1559  ;;  %v1740_v35 = vpop.xlane.xlu1 %1739 }
 0x42a   : > { %2416 = vpow2.f32 %v1382_v33  ;;  %v1561_v36 = vsub.f32 %v2965_v57, %v1560_v34  ;;  %v1741_v37 = vsub.f32 %v2967_v60, %v1740_v35 }
 0x42c   : > { %v1562_v38 = vmul.f32 1.442695, %v1561_v36  ;;  %v1742_v39 = vmul.f32 1.442695, %v1741_v37 }
 0x42d   : > { %v1570_v40 = vpop.permute.xlu0 %1569  ;;  %v1752_v43 = vpop.permute.xlu1 %1751 }
 0x42e   : > { %2418 = vpow2.f32 %v1562_v38  ;;  %v2085_v38 = vld [vmem:[%s3145_s18] ss:$0 sm:$0xff] }
 0x42f   : > { %2420 = vpow2.f32 %v1742_v39 }
 0x431   : > { %v1750_v46 = vpop.permute.xlu0 %1749 }
 0x437   : > { %v2417_v41 = vpop.eup %2416 }
 0x438   : > { %2225 = vmatmul.mubr.msk.f32.vlgmr.msra.gmra.mxu1 %vm490_vm5, %v2417_v41  ;;  %v1384_v42 = vsel %vm490_vm5, %v2417_v41, 0.0 }
 0x439   : > { %2233 = vmatpush3.msra.mxu1 %v1572_v30  ;;  %1385 = vadd.xlane.f32.xlu0 %v1384_v42 }
 0x43a   : > { %2234 = vmatprep.subr.mxu1 %v2651_v17  ;;  %2236 = vmatprep.mubr.msk.f32.mxu1 %vm2652_vm3, %v2651_v17 }
 0x43b   : > { %v2419_v44 = vpop.eup %2418  ;;  %2235 = vmatpush3.msra.mxu1 %v1570_v40 }
 0x43c   : > { %v2421_v45 = vpop.eup %2420  ;;  %2244 = vmatprep.subr.mxu1 %v2651_v17  ;;  %2237 = vmatmul.mubr.msk.f32.vlgmr.msra.gmra.mxu1 %vm490_vm5, %v2419_v44  ;;  %v1564_v47 = vsel %vm490_vm5, %v2419_v44, 0.0 }
 0x43d   : > { %2245 = vmatpush3.msra.mxu1 %v1752_v43  ;;  %1565 = vadd.xlane.f32.xlu1 %v1564_v47  ;;  %v1744_v48 = vsel %vm490_vm5, %v2421_v45, 0.0 }
 0x43e   : > { %1745 = vadd.xlane.f32.xlu0 %v1744_v48  ;;  %2246 = vmatprep.subr.mxu1 %v2651_v17 }
 0x43f   : > { %2247 = vmatpush3.msra.mxu1 %v1750_v46  ;;  %2248 = vmatprep.mubr.msk.f32.mxu1 %vm2652_vm3, %v2651_v17 }
 0x440   : > { %2249 = vmatmul.mubr.msk.f32.vlgmr.msra.gmra.mxu1 %vm490_vm5, %v2421_v45 }
 0x441   : > { %498 = vadd.xlane.f32.xlu1 %v497_v49 }
 0x448   : > { %v569_v50 = vpop.f32.mrf.mxu1 }
 0x44a   : > { %v2166_v51 = vpop.f32.mrf.mxu1 }
 0x485   : > { %v666_v52 = vpop.xlane.xlu1 %665 }
 0x486   : > { %2422 = vrcp.f32 %v666_v52 }
 0x489   : > { %v846_v53 = vpop.xlane.xlu0 %845 }
 0x48a   : > { %2424 = vrcp.f32 %v846_v53 }
 0x48d   : > { %v1026_v54 = vpop.xlane.xlu0 %1025 }
 0x48e   : > { %2426 = vrcp.f32 %v1026_v54 }
 0x491   : > { %v1206_v55 = vpop.xlane.xlu1 %1205 }
 0x492   : > { %2428 = vrcp.f32 %v1206_v55 }
 0x493   : > { %v2423_v56 = vpop.eup %2422 }
 0x497   : > { %v2425_v60 = vpop.eup %2424 }
 0x49b   : > { %v2427_v0 = vpop.eup %2426 }
 0x49f   : > { %v2429_v5 = vpop.eup %2428 }
 0x4bb   : > { %v744_v57 = vpop.f32.mrf.mxu1 }
 0x4bc   : > { %v749_v58 = vmul.f32 %v2423_v56, %v744_v57 }
 0x4bd   : > { %v2178_v59 = vpop.f32.mrf.mxu1 }
 0x4be   : > { %751 = vrot.lane.b32.xlu0 %v749_v58, %s2660_s27 }
 0x4bf   : > { %v924_v61 = vpop.f32.mrf.mxu1 }
 0x4c0   : > { %v929_v62 = vmul.f32 %v2425_v60, %v924_v61 }
 0x4c1   : > { %v2190_v63 = vpop.f32.mrf.mxu1 }
 0x4c2   : > { %931 = vrot.lane.b32.xlu1 %v929_v62, %s2661_s8  ;;  %v1386_v12 = vpop.xlane.xlu0 %1385  ;;  %s3146_s8 = sld [smem:[#allocation23_spill]] }
 0x4c3   : > { %v1104_v1 = vpop.f32.mrf.mxu1 }
 0x4c4   : > { %v1109_v2 = vmul.f32 %v2427_v0, %v1104_v1 }
 0x4c5   : > { %v2202_v3 = vpop.f32.mrf.mxu1 }
 0x4c6   : > { %v1566_v4 = vpop.xlane.xlu1 %1565  ;;  %1111 = vrot.lane.b32.xlu1 %v1109_v2, %s2662_s12 }
 0x4c7   : > { %v1284_v6 = vpop.f32.mrf.mxu1  ;;  %v1746_v13 = vpop.xlane.xlu0 %1745 }
 0x4c8   : > { %v1289_v7 = vmul.f32 %v2429_v5, %v1284_v6  ;;  %s3053_s12 = scalar_lea.hbm %s3146_s8, %s2089_s9 }
 0x4c9   : > { %v2214_v8 = vpop.f32.mrf.mxu1 }
 0x4ca   : > { %v499_v9 = vpop.xlane.xlu1 %498  ;;  %1291 = vrot.lane.b32.xlu0 %v1289_v7, %s2663_s11  ;;  %s2667_s11 = smov [#allocation12]  }
 0x4cb   : > { %2430 = vrcp.f32 %v499_v9 }
 0x4cc   : > { %2432 = vrcp.f32 %v1386_v12 }
 0x4cd   : > { %2434 = vrcp.f32 %v1566_v4 }
 0x4ce   : > { %2436 = vrcp.f32 %v1746_v13 }
 0x4d8   : > { %v2431_v10 = vpop.eup %2430 }
 0x4d9   : > { %v574_v11 = vmul.f32 %v2431_v10, %v569_v50  ;;  %v2433_v16 = vpop.eup %2432 }
 0x4da   : > { %v2435_v23 = vpop.eup %2434 }
 0x4db   : > { %575 = vst.msk [vmem:[#allocation5] sm:$0xff] %vm412_vm4, %v574_v11  ;;  %v2437_v27 = vpop.eup %2436 }
 0x4f8   : > { %v1464_v18 = vpop.f32.mrf.mxu1 }
 0x4f9   : > { %v1469_v20 = vmul.f32 %v2433_v16, %v1464_v18 }
 0x4fa   : > { %v2226_v21 = vpop.f32.mrf.mxu1 }
 0x4fb   : > { %1471 = vrot.lane.b32.xlu1 %v1469_v20, %s2664_s28  ;;  %s2522_s28 = sshll.u32 %s2667_s11, 4  ;;  %s2523_s28 = int_to_ptr.vmem [resolvable:$false] %s2522_s28 }
 0x4fc   : > { %v1644_v24 = vpop.f32.mrf.mxu1  ;;  %p2525_p5 = scmp.lt.s32.totalorder %s1940_s15, %s2523_s28 }
 0x4fd   : > { %v1649_v25 = vmul.f32 %v2435_v23, %v1644_v24 }
 0x4fe   : > { %v2238_v26 = vpop.f32.mrf.mxu1 }
 0x4ff   : > { %1651 = vrot.lane.b32.xlu0 %v1649_v25, %s2665_s30  ;;  %s2524_s30 = scalar_lea.vmem %s2523_s28, 256 }
 0x500   : > { %v1824_v28 = vpop.f32.mrf.mxu1  ;;  %p2526_p12 = scmp.lt.s32.totalorder %s2524_s30, %s2518_s22 }
 0x501   : > { %v1829_v29 = vmul.f32 %v2437_v27, %v1824_v28 }
 0x502   : > { %v2250_v30 = vpop.f32.mrf.mxu1  ;;  %p2527_p0 = por %p2526_p12, %p2525_p5 }
 0x503   : > { %1831 = vrot.lane.b32.xlu1 %v1829_v29, %s2666_s7 }
 0x504   : > { %p2528_p2 = pnand %p2527_p0, %p2521_p11 }
 0x530   : > { %v752_v31 = vpop.permute.xlu0 %751 }
 0x531   : > { %755 = vst.msk [vmem:[#allocation5] sm:$0xff] %vm754_vm6, %v752_v31 }
 0x534   : > { %v932_v32 = vpop.permute.xlu1 %931 }
 0x535   : > { %935 = vst.msk [vmem:[#allocation5] sm:$0xff] %vm934_vm7, %v932_v32 }
 0x538   : > { %v1112_v33 = vpop.permute.xlu1 %1111 }
 0x539   : > { %1115 = vst.msk [vmem:[#allocation5] sm:$0xff] %vm1114_vm8, %v1112_v33 }
 0x53c   : > { %v1292_v17 = vpop.permute.xlu0 %1291 }
 0x53d   : > { %1295 = vst.msk [vmem:[#allocation5] sm:$0xff] %vm1294_vm9, %v1292_v17 }
 0x56d   : > { %v1472_v34 = vpop.permute.xlu1 %1471 }
 0x56e   : > { %1475 = vst.msk [vmem:[#allocation5] sm:$0xff] %vm1474_vm10, %v1472_v34 }
 0x571   : > { %v1652_v35 = vpop.permute.xlu0 %1651 }
 0x572   : > { %1655 = vst.msk [vmem:[#allocation5] sm:$0xff] %vm1654_vm11, %v1652_v35 }
 0x575   : > { %v1832_v36 = vpop.permute.xlu1 %1831 }
 0x576   : > { %1835 = vst.msk [vmem:[#allocation5] sm:$0xff] %vm1834_vm12, %v1832_v36 }
 0x57d   : > { %v1836_v37 = vld [vmem:[#allocation5] sm:$0xff] }
 0x57e   : > { %2260 = vmatmul.mubr.msk.f32.vlgmr.msra.gmra.mxu0 %vm1848_vm13, %v1836_v37 }
 0x63e   : > { %v1918_v39 = vpop.f32.mrf.mxu0 }
 0x63f   : > { %v1919_v40 = vadd.f32 %v2085_v38, %v1918_v39 }
 0x640   : > { %v2261_v41 = vpop.f32.mrf.mxu0 }
 0x641   : > { %1922 = vst.msk [vmem:[%s258_s4] sm:$0xff] %vm1848_vm13, %v1919_v40 }
 0x642   : > { %2531 = shalt.err (!%p2528_p2)
}
 0x643   : > { %s2532_s3 = scalar_lea.hbm %s3053_s12, 128  ;;  %s2536_s7 = scalar_lea.hbm %s3146_s8, 512 }
 0x644   : > { %p2533_p4 = scmp.ne.s32.totalorder %s3053_s12, %s2532_s3  ;;  %p2537_p10 = scmp.lt.s32.totalorder %s3053_s12, %s3146_s8 }
 0x645   : > { %p2538_p6 = scmp.lt.s32.totalorder %s2536_s7, %s2532_s3 }
 0x646   : > { %p2534_p13 = pnand %p2533_p4, %p2764_p7 }
 0x647   : > { %p2539_p9 = por %p2538_p6, %p2537_p10 }
 0x648   : > { %p2535_p8 = pneg %p2534_p13 }
 0x64a   : > { %p2540_p1 = pnand %p2539_p9, %p2535_p8 }
 0x64c   : > { %2543 = shalt.err (!%p2540_p1)
}
 0x64d   : > { %2272 = dma.vmem_to_hbm [thread:$0]  (%p2764_p7), %s1940_s15, 128, %s3053_s12, %s1924_s21  }
 0x64e PF: > { %s3147_s1 = sld [smem:[#allocation16_spill]]  ;;  %p2294_p3 = scmp.ge.s32.totalorder %s2642_s25, 2 }
 0x64f   : > { %s3148_s29 = sld [smem:[#allocation18_spill]] }
 0x654   : > { %s1951_s18 = sand.u32 1, %s3147_s1  }
 0x655   : > { %p3149_p11 = scmp.ne.s32.totalorder %s3148_s29, 0  ;;  %s1952_s9 = scalar_lea.sflag [#allocation8], %s1951_s18 }
 0x657   : > { %p2286_p5 = pnand %p2294_p3, %p3149_p11 }
 0x659   : > { %p2287_p12 = pneg %p2286_p5 }
 0x65b   : > { %2597 = dma.done.wait (%p2287_p12), %s1952_s9, 128  }
 0x65c   : > { %2599 = vsyncadd (%p2287_p12), %s1952_s9, 4294967168  ;;  %s21_s25 = sadd.s32 1, %s2642_s25   ;;  %s3150_s21 = sld [smem:[#allocation17_spill]] }
 0x65d   : > { %p18_p0 = scmp.ge.s32.totalorder %s21_s25, 6   ;;  %s3151_s5 = sld [smem:[#allocation19_spill]] }
 0x65e   : > { %s3152_s15 = smov %s2606_s16  ;;  %s3153_s16 = smov %s2610_s17 }
 0x65f   : > { %s3154_s17 = smov %s2841_s23  ;;  %s3155_s18 = smov %s2618_s19 }
 0x660   : > { %s3156_s19 = smov %s2622_s20  ;;  %s3157_s20 = smov %s2836_s6 }
 0x661   : > { %s3158_s22 = smov %s2638_s24  ;;  %s3160_s24 = smov %s3166_s10 }
 0x662   :  { %20 = sbr.rel (!%p18_p0) target bundleno = 15 (0xf), region = 94 }
 0x663   : > { %s3159_s23 = smov %s3151_s5 }
 0x667   :  { %1957 = vsyncpa [#allocation7], 1 }
 0x668   :  { %1959 = vsyncpa [#allocation7 + $0x1], 1 }
 0x669   :  { %1960 = vsyncpa [#allocation10], 1 }
 0x66a   :  { %1961 = vsyncpa [#allocation8], 1 }
 0x66b   :  { %1963 = vsyncpa [#allocation8 + $0x1], 1 }

</bundles_post_ra>
